<compile_context>
chip_gen: v7x
topology: tpu7x:2x2x1
jax: 0.10.0
libtpu: 0.0.40
codegen_flags: <defaults>
</compile_context>

<pallas_src>
import jax
import jax.numpy as jnp
from jax.experimental import pallas as pl
from jax.experimental.pallas import tpu as pltpu


def _round_up(n, m):
    return ((n + m - 1) // m) * m


def _mlp_regressor_kernel(x_ref, z_ref, w_ref, b_ref, wh_ref, bh_ref, out_ref):
    """One batch block of the whole forward pass.

    x_ref : (L, sb, P)         bf16  position-major input slab: x[b, c, l] -> [l, b, c]
    z_ref : (1, 1)             f32   SMEM scalar z ~ N(0,1)
    w_ref : (num_layers, P, P) bf16  1x1-conv weights (in, out), zero-padded to P
    b_ref : (num_layers, 1, P) f32   biases
    wh_ref: (L, P, 2*Opad)     bf16  per-position head weights [mu || log_var]
    bh_ref: (1, 2*Opad)        f32   head biases [mu || log_var]
    out_ref: (sb, Opad)        f32   z*mu + exp(0.5*log_var), lane-dense
    """
    L, sb, P = x_ref.shape
    num_layers = w_ref.shape[0]
    opad = out_ref.shape[1]

    # (L, sb, P) -> (L*sb, P): merges the two sublane-major dims; layout no-op.
    h = x_ref[...].reshape(L * sb, P)

    for i in range(num_layers):                      # static unroll (small)
        acc = jnp.dot(h, w_ref[i], preferred_element_type=jnp.float32) + b_ref[i]
        h = jnp.maximum(acc, 0.0).astype(jnp.bfloat16)
        # TODO(synk): dropout with p > 0 not implemented (module default drop_out=0.0 -> identity).

    # Head convs (kernel_size == seq_length): full (L, P) contraction done as L
    # accumulated (sb, P) @ (P, 2*Opad) matmuls (identical MAC count, no relayout).
    h3 = h.reshape(L, sb, P)
    head = jnp.dot(h3[0], wh_ref[0], preferred_element_type=jnp.float32)
    for l in range(1, L):
        head = head + jnp.dot(h3[l], wh_ref[l], preferred_element_type=jnp.float32)
    head = head + bh_ref[...]

    mu = head[:, :opad]                 # 128-aligned -> vreg-aligned slices
    log_var = head[:, opad:]
    z = z_ref[0, 0]
    # sample_norm: z * r_mu + sqrt(exp(r_log_var)); sqrt(exp(v)) == exp(0.5*v)
    out_ref[...] = z * mu + jnp.exp(0.5 * log_var)


def pack_params(params, seq_length):
    """Pack module parameters into 4 z-independent arrays.

    The result depends only on the model weights, so compute it ONCE per model
    and reuse it across every forward call of a sampling loop.
    """
    layers = params["layers"]
    hidden = layers[-1][0].shape[1]
    c_in0 = layers[0][0].shape[0]
    L = seq_length
    nl = len(layers)
    P = _round_up(max(c_in0, hidden), 128)       # lane-dense channel dim
    O = params["bm"].shape[1]
    Opad = _round_up(O, 128)                     # lane-dense per-head output dim

    w_stack = jnp.zeros((nl, P, P), jnp.float32)
    b_stack = jnp.zeros((nl, 1, P), jnp.float32)
    for i, (w, b) in enumerate(layers):
        w_stack = w_stack.at[i, : w.shape[0], : w.shape[1]].set(w)
        b_stack = b_stack.at[i, :, : b.shape[1]].set(b)

    # Head weights in canonical (L, H, O) layout -> (L, P, 2*Opad), mu || log_var.
    wh = jnp.zeros((L, P, 2 * Opad), jnp.float32)
    wh = wh.at[:, :hidden, :O].set(params["wm"])
    wh = wh.at[:, :hidden, Opad:Opad + O].set(params["wv"])
    bh = jnp.zeros((1, 2 * Opad), jnp.float32)
    bh = bh.at[:, :O].set(params["bm"])
    bh = bh.at[:, Opad:Opad + O].set(params["bv"])

    return {
        "w": w_stack.astype(jnp.bfloat16),
        "b": b_stack,
        "wh": wh.astype(jnp.bfloat16),
        "bh": bh,
    }


def _choose_block_batch(B):
    if B <= 32:
        # One small block; splitting tiny batches is pure per-step overhead.
        return _round_up(max(B, 16), 16)
    sb = min(512, _round_up(B, 16))
    if _round_up(B, sb) // sb < 2:
        # Guarantee >= 2 grid steps so dimension_semantics=("parallel",) can
        # shard across v7x's two TensorCores.
        sb = max(16, _round_up((B + 1) // 2, 16))
    return sb


def mlp_regressor_conv(x, t, params, z, *, packed=None, block_batch=None):
    """x: (B, C_in, L) in PyTorch NCW layout.  t is accepted and unused (as in torch).

    `packed` (from pack_params) is z-independent; compute it once per model and
    pass it in to keep parameter packing off the per-step critical path.
    """
    del t
    B, C_in, L = x.shape
    if packed is None:
        packed = pack_params(params, L)
    w_stack, b_stack, w_head, b_head = packed["w"], packed["b"], packed["wh"], packed["bh"]
    nl, P, _ = w_stack.shape
    Opad = b_head.shape[1] // 2
    O = params["bm"].shape[1]

    sb = _choose_block_batch(B) if block_batch is None else _round_up(block_batch, 16)
    Bp = _round_up(B, sb)

    # Position-major packed slab x_slab[l, b, c] = x[b, c, l], channels zero-padded
    # to the lane-dense P -- exactly the layout every in-kernel matmul consumes.
    # TODO(synk): at large B, pre-pack x upstream (or enable allow_input_fusion) to
    # avoid the extra HBM round-trip of this repack before the kernel reads it.
    xt = jnp.transpose(x, (2, 0, 1)).astype(jnp.float32)          # (L, B, C_in)
    xt = jnp.pad(xt, ((0, 0), (0, Bp - B), (0, P - C_in)))
    x_slab = xt.astype(jnp.bfloat16)                               # (L, Bp, P)

    z_arr = jnp.asarray(z, jnp.float32).reshape(1, 1)

    out = pl.pallas_call(
        _mlp_regressor_kernel,
        out_shape=jax.ShapeDtypeStruct((Bp, Opad), jnp.float32),
        grid=(Bp // sb,),
        in_specs=[
            pl.BlockSpec((L, sb, P), lambda i: (0, i, 0)),
            pl.BlockSpec(memory_space=pltpu.MemorySpace.SMEM),     # z scalar
            pl.BlockSpec((nl, P, P), lambda i: (0, 0, 0)),
            pl.BlockSpec((nl, 1, P), lambda i: (0, 0, 0)),
            pl.BlockSpec((L, P, 2 * Opad), lambda i: (0, 0, 0)),
            pl.BlockSpec((1, 2 * Opad), lambda i: (0, 0)),
        ],
        out_specs=pl.BlockSpec((sb, Opad), lambda i: (i, 0)),
        compiler_params=pltpu.CompilerParams(
            dimension_semantics=("parallel",),
            # Explicit (defaults are 16-32 MiB scoped); usage here is a few MiB,
            # and 64 MiB stays <= v7x's physical VMEM.
            vmem_limit_bytes=64 * 1024 * 1024,
        ),
    )(x_slab, z_arr, w_stack, b_stack, w_head, b_head)
    return out[:B, :O]


def init_params(key, input_size, hidden_channels, num_layers, output_channels,
                seq_length):
    """Deterministic synthetic parameters with the same shapes as the torch module."""
    keys = jax.random.split(key, 2 * num_layers + 4)
    ki = 0
    layers = []
    c_in = input_size
    for _ in range(num_layers):
        w = jax.random.normal(keys[ki], (c_in, hidden_channels), jnp.float32) * 0.1
        ki += 1
        b = jax.random.normal(keys[ki], (1, hidden_channels), jnp.float32) * 0.1
        ki += 1
        layers.append((w, b))
        c_in = hidden_channels
    # head conv weights: torch layout (O, H, L) -> canonical (L, H, O)
    wm_t = jax.random.normal(keys[ki], (output_channels, hidden_channels, seq_length),
                             jnp.float32) * 0.1
    ki += 1
    bm = jax.random.normal(keys[ki], (1, output_channels), jnp.float32) * 0.1
    ki += 1
    wv_t = jax.random.normal(keys[ki], (output_channels, hidden_channels, seq_length),
                             jnp.float32) * 0.1
    ki += 1
    bv = jax.random.normal(keys[ki], (1, output_channels), jnp.float32) * 0.1
    return {
        "layers": layers,
        "wm": jnp.transpose(wm_t, (2, 1, 0)),
        "bm": bm,
        "wv": jnp.transpose(wv_t, (2, 1, 0)),
        "bv": bv,
    }


def reference(x, params, z):
    """Pure-JAX f32 reference mirroring the torch forward (correctness check)."""
    h = x.astype(jnp.float32)                                 # (B, C, L)
    for w, b in params["layers"]:
        h = jnp.einsum("bil,io->bol", h, w) + b[0][None, :, None]
        h = jnp.maximum(h, 0.0)
    mu = jnp.einsum("bhl,lho->bo", h, params["wm"]) + params["bm"]
    lv = jnp.einsum("bhl,lho->bo", h, params["wv"]) + params["bv"]
    return z * mu + jnp.sqrt(jnp.exp(lv))


if __name__ == "__main__":
    B = 2
    input_size = 4
    hidden_channels = 32
    num_layers = 3
    output_channels = 4
    seq_length = 8

    key = jax.random.PRNGKey(0)
    k_x, k_z, k_p, k_t = jax.random.split(key, 4)

    x = jax.random.normal(k_x, (B, input_size, seq_length), jnp.float32)
    t = jax.random.normal(k_t, (B,), jnp.float32)    # unused, as in the torch forward
    z = jax.random.normal(k_z, (), jnp.float32)      # Normal(0,1).sample() scalar
    params = init_params(k_p, input_size, hidden_channels, num_layers,
                         output_channels, seq_length)

    # z-independent packing: done ONCE, reused across all sampling-loop steps.
    packed = pack_params(params, seq_length)

    out = mlp_regressor_conv(x, t, params, z, packed=packed)
    out = jax.block_until_ready(out)

    ref = reference(x, params, z)
    assert out.shape == (B, output_channels), out.shape
    # bf16 MXU operands (f32 accumulation / f32 epilogue) -> slightly looser tolerance.
    assert jnp.allclose(out, ref, atol=3e-2, rtol=3e-2), (out, ref)

    print("KERNEL_OK")
</pallas_src>

<mosaic_0001>
module attributes {stable_mosaic.version = 11 : i64} {
  func.func @_mlp_regressor_kernel(%arg0: i32, %arg1: memref<8x16x128xbf16, #tpu.memory_space<vmem>>, %arg2: memref<1x1xf32, #tpu.memory_space<smem>>, %arg3: memref<3x128x128xbf16, #tpu.memory_space<vmem>>, %arg4: memref<3x1x128xf32, #tpu.memory_space<vmem>>, %arg5: memref<8x128x256xbf16, #tpu.memory_space<vmem>>, %arg6: memref<1x256xf32, #tpu.memory_space<vmem>>, %arg7: memref<16x128xf32, #tpu.memory_space<vmem>>) attributes {dimension_semantics = [#tpu.dimension_semantics<parallel>], iteration_bounds = array<i64: 1>, scalar_prefetch = 0 : i64, scratch_operands = 0 : i64, tpu.core_type = #tpu.core_type<tc>, window_params = [{transform_indices = @transform_0, window_bounds = array<i64: 8, 16, 128>}, {transform_indices = @transform_1, window_bounds = array<i64: 1, 1>}, {pipeline_mode = #tpu.pipeline_mode<synchronous>, transform_indices = @transform_2, window_bounds = array<i64: 3, 128, 128>}, {pipeline_mode = #tpu.pipeline_mode<synchronous>, transform_indices = @transform_3, window_bounds = array<i64: 3, 1, 128>}, {pipeline_mode = #tpu.pipeline_mode<synchronous>, transform_indices = @transform_4, window_bounds = array<i64: 8, 128, 256>}, {pipeline_mode = #tpu.pipeline_mode<synchronous>, transform_indices = @transform_5, window_bounds = array<i64: 1, 256>}, {transform_indices = @transform_6, window_bounds = array<i64: 16, 128>}]} {
    %c0 = arith.constant 0 : index
    %c0_0 = arith.constant 0 : index
    %c0_1 = arith.constant 0 : index
    %0 = vector.load %arg1[%c0, %c0_0, %c0_1] : memref<8x16x128xbf16, #tpu.memory_space<vmem>>, vector<8x16x128xbf16>
    %1 = vector.shape_cast %0 : vector<8x16x128xbf16> to vector<128x128xbf16>
    %c0_2 = arith.constant 0 : index
    %c0_3 = arith.constant 0 : index
    %c0_4 = arith.constant 0 : index
    %2 = vector.load %arg3[%c0_2, %c0_3, %c0_4] : memref<3x128x128xbf16, #tpu.memory_space<vmem>>, vector<1x128x128xbf16>
    %3 = vector.shape_cast %2 : vector<1x128x128xbf16> to vector<128x128xbf16>
    %cst = arith.constant dense<0.000000e+00> : vector<128x128xf32>
    %4 = tpu.matmul %1, %3, %cst {dimension_numbers = #tpu.dot_dimension_numbers<[1], [0], [0], [1], [0, 0, 1, 1], [], []>} : vector<128x128xbf16>, vector<128x128xbf16>, vector<128x128xf32> -> vector<128x128xf32>
    %c0_5 = arith.constant 0 : index
    %c0_6 = arith.constant 0 : index
    %c0_7 = arith.constant 0 : index
    %5 = vector.load %arg4[%c0_5, %c0_6, %c0_7] : memref<3x1x128xf32, #tpu.memory_space<vmem>>, vector<1x1x128xf32>
    %6 = vector.shape_cast %5 : vector<1x1x128xf32> to vector<1x128xf32>
    %7 = vector.broadcast %6 : vector<1x128xf32> to vector<128x128xf32>
    %8 = arith.addf %4, %7 : vector<128x128xf32>
    %cst_8 = arith.constant 0.000000e+00 : f32
    %9 = vector.broadcast %cst_8 : f32 to vector<128x128xf32>
    %10 = arith.maximumf %8, %9 : vector<128x128xf32>
    %11 = arith.truncf %10 : vector<128x128xf32> to vector<128x128xbf16>
    %c1 = arith.constant 1 : index
    %c0_9 = arith.constant 0 : index
    %c0_10 = arith.constant 0 : index
    %12 = vector.load %arg3[%c1, %c0_9, %c0_10] : memref<3x128x128xbf16, #tpu.memory_space<vmem>>, vector<1x128x128xbf16>
    %13 = vector.shape_cast %12 : vector<1x128x128xbf16> to vector<128x128xbf16>
    %cst_11 = arith.constant dense<0.000000e+00> : vector<128x128xf32>
    %14 = tpu.matmul %11, %13, %cst_11 {dimension_numbers = #tpu.dot_dimension_numbers<[1], [0], [0], [1], [0, 0, 1, 1], [], []>} : vector<128x128xbf16>, vector<128x128xbf16>, vector<128x128xf32> -> vector<128x128xf32>
    %c1_12 = arith.constant 1 : index
    %c0_13 = arith.constant 0 : index
    %c0_14 = arith.constant 0 : index
    %15 = vector.load %arg4[%c1_12, %c0_13, %c0_14] : memref<3x1x128xf32, #tpu.memory_space<vmem>>, vector<1x1x128xf32>
    %16 = vector.shape_cast %15 : vector<1x1x128xf32> to vector<1x128xf32>
    %17 = vector.broadcast %16 : vector<1x128xf32> to vector<128x128xf32>
    %18 = arith.addf %14, %17 : vector<128x128xf32>
    %cst_15 = arith.constant 0.000000e+00 : f32
    %19 = vector.broadcast %cst_15 : f32 to vector<128x128xf32>
    %20 = arith.maximumf %18, %19 : vector<128x128xf32>
    %21 = arith.truncf %20 : vector<128x128xf32> to vector<128x128xbf16>
    %c2 = arith.constant 2 : index
    %c0_16 = arith.constant 0 : index
    %c0_17 = arith.constant 0 : index
    %22 = vector.load %arg3[%c2, %c0_16, %c0_17] : memref<3x128x128xbf16, #tpu.memory_space<vmem>>, vector<1x128x128xbf16>
    %23 = vector.shape_cast %22 : vector<1x128x128xbf16> to vector<128x128xbf16>
    %cst_18 = arith.constant dense<0.000000e+00> : vector<128x128xf32>
    %24 = tpu.matmul %21, %23, %cst_18 {dimension_numbers = #tpu.dot_dimension_numbers<[1], [0], [0], [1], [0, 0, 1, 1], [], []>} : vector<128x128xbf16>, vector<128x128xbf16>, vector<128x128xf32> -> vector<128x128xf32>
    %c2_19 = arith.constant 2 : index
    %c0_20 = arith.constant 0 : index
    %c0_21 = arith.constant 0 : index
    %25 = vector.load %arg4[%c2_19, %c0_20, %c0_21] : memref<3x1x128xf32, #tpu.memory_space<vmem>>, vector<1x1x128xf32>
    %26 = vector.shape_cast %25 : vector<1x1x128xf32> to vector<1x128xf32>
    %27 = vector.broadcast %26 : vector<1x128xf32> to vector<128x128xf32>
    %28 = arith.addf %24, %27 : vector<128x128xf32>
    %cst_22 = arith.constant 0.000000e+00 : f32
    %29 = vector.broadcast %cst_22 : f32 to vector<128x128xf32>
    %30 = arith.maximumf %28, %29 : vector<128x128xf32>
    %31 = arith.truncf %30 : vector<128x128xf32> to vector<128x128xbf16>
    %32 = vector.shape_cast %31 : vector<128x128xbf16> to vector<8x16x128xbf16>
    %33 = vector.extract_strided_slice %32 {offsets = [0, 0, 0], sizes = [1, 16, 128], strides = [1, 1, 1]} : vector<8x16x128xbf16> to vector<1x16x128xbf16>
    %34 = vector.shape_cast %33 : vector<1x16x128xbf16> to vector<16x128xbf16>
    %c0_23 = arith.constant 0 : index
    %c0_24 = arith.constant 0 : index
    %c0_25 = arith.constant 0 : index
    %35 = vector.load %arg5[%c0_23, %c0_24, %c0_25] : memref<8x128x256xbf16, #tpu.memory_space<vmem>>, vector<1x128x256xbf16>
    %36 = vector.shape_cast %35 : vector<1x128x256xbf16> to vector<128x256xbf16>
    %cst_26 = arith.constant dense<0.000000e+00> : vector<16x256xf32>
    %37 = tpu.matmul %34, %36, %cst_26 {dimension_numbers = #tpu.dot_dimension_numbers<[1], [0], [0], [1], [0, 0, 1, 1], [], []>} : vector<16x128xbf16>, vector<128x256xbf16>, vector<16x256xf32> -> vector<16x256xf32>
    %38 = vector.extract_strided_slice %32 {offsets = [1, 0, 0], sizes = [1, 16, 128], strides = [1, 1, 1]} : vector<8x16x128xbf16> to vector<1x16x128xbf16>
    %39 = vector.shape_cast %38 : vector<1x16x128xbf16> to vector<16x128xbf16>
    %c1_27 = arith.constant 1 : index
    %c0_28 = arith.constant 0 : index
    %c0_29 = arith.constant 0 : index
    %40 = vector.load %arg5[%c1_27, %c0_28, %c0_29] : memref<8x128x256xbf16, #tpu.memory_space<vmem>>, vector<1x128x256xbf16>
    %41 = vector.shape_cast %40 : vector<1x128x256xbf16> to vector<128x256xbf16>
    %cst_30 = arith.constant dense<0.000000e+00> : vector<16x256xf32>
    %42 = tpu.matmul %39, %41, %cst_30 {dimension_numbers = #tpu.dot_dimension_numbers<[1], [0], [0], [1], [0, 0, 1, 1], [], []>} : vector<16x128xbf16>, vector<128x256xbf16>, vector<16x256xf32> -> vector<16x256xf32>
    %43 = arith.addf %37, %42 : vector<16x256xf32>
    %44 = vector.extract_strided_slice %32 {offsets = [2, 0, 0], sizes = [1, 16, 128], strides = [1, 1, 1]} : vector<8x16x128xbf16> to vector<1x16x128xbf16>
    %45 = vector.shape_cast %44 : vector<1x16x128xbf16> to vector<16x128xbf16>
    %c2_31 = arith.constant 2 : index
    %c0_32 = arith.constant 0 : index
    %c0_33 = arith.constant 0 : index
    %46 = vector.load %arg5[%c2_31, %c0_32, %c0_33] : memref<8x128x256xbf16, #tpu.memory_space<vmem>>, vector<1x128x256xbf16>
    %47 = vector.shape_cast %46 : vector<1x128x256xbf16> to vector<128x256xbf16>
    %cst_34 = arith.constant dense<0.000000e+00> : vector<16x256xf32>
    %48 = tpu.matmul %45, %47, %cst_34 {dimension_numbers = #tpu.dot_dimension_numbers<[1], [0], [0], [1], [0, 0, 1, 1], [], []>} : vector<16x128xbf16>, vector<128x256xbf16>, vector<16x256xf32> -> vector<16x256xf32>
    %49 = arith.addf %43, %48 : vector<16x256xf32>
    %50 = vector.extract_strided_slice %32 {offsets = [3, 0, 0], sizes = [1, 16, 128], strides = [1, 1, 1]} : vector<8x16x128xbf16> to vector<1x16x128xbf16>
    %51 = vector.shape_cast %50 : vector<1x16x128xbf16> to vector<16x128xbf16>
    %c3 = arith.constant 3 : index
    %c0_35 = arith.constant 0 : index
    %c0_36 = arith.constant 0 : index
    %52 = vector.load %arg5[%c3, %c0_35, %c0_36] : memref<8x128x256xbf16, #tpu.memory_space<vmem>>, vector<1x128x256xbf16>
    %53 = vector.shape_cast %52 : vector<1x128x256xbf16> to vector<128x256xbf16>
    %cst_37 = arith.constant dense<0.000000e+00> : vector<16x256xf32>
    %54 = tpu.matmul %51, %53, %cst_37 {dimension_numbers = #tpu.dot_dimension_numbers<[1], [0], [0], [1], [0, 0, 1, 1], [], []>} : vector<16x128xbf16>, vector<128x256xbf16>, vector<16x256xf32> -> vector<16x256xf32>
    %55 = arith.addf %49, %54 : vector<16x256xf32>
    %56 = vector.extract_strided_slice %32 {offsets = [4, 0, 0], sizes = [1, 16, 128], strides = [1, 1, 1]} : vector<8x16x128xbf16> to vector<1x16x128xbf16>
    %57 = vector.shape_cast %56 : vector<1x16x128xbf16> to vector<16x128xbf16>
    %c4 = arith.constant 4 : index
    %c0_38 = arith.constant 0 : index
    %c0_39 = arith.constant 0 : index
    %58 = vector.load %arg5[%c4, %c0_38, %c0_39] : memref<8x128x256xbf16, #tpu.memory_space<vmem>>, vector<1x128x256xbf16>
    %59 = vector.shape_cast %58 : vector<1x128x256xbf16> to vector<128x256xbf16>
    %cst_40 = arith.constant dense<0.000000e+00> : vector<16x256xf32>
    %60 = tpu.matmul %57, %59, %cst_40 {dimension_numbers = #tpu.dot_dimension_numbers<[1], [0], [0], [1], [0, 0, 1, 1], [], []>} : vector<16x128xbf16>, vector<128x256xbf16>, vector<16x256xf32> -> vector<16x256xf32>
    %61 = arith.addf %55, %60 : vector<16x256xf32>
    %62 = vector.extract_strided_slice %32 {offsets = [5, 0, 0], sizes = [1, 16, 128], strides = [1, 1, 1]} : vector<8x16x128xbf16> to vector<1x16x128xbf16>
    %63 = vector.shape_cast %62 : vector<1x16x128xbf16> to vector<16x128xbf16>
    %c5 = arith.constant 5 : index
    %c0_41 = arith.constant 0 : index
    %c0_42 = arith.constant 0 : index
    %64 = vector.load %arg5[%c5, %c0_41, %c0_42] : memref<8x128x256xbf16, #tpu.memory_space<vmem>>, vector<1x128x256xbf16>
    %65 = vector.shape_cast %64 : vector<1x128x256xbf16> to vector<128x256xbf16>
    %cst_43 = arith.constant dense<0.000000e+00> : vector<16x256xf32>
    %66 = tpu.matmul %63, %65, %cst_43 {dimension_numbers = #tpu.dot_dimension_numbers<[1], [0], [0], [1], [0, 0, 1, 1], [], []>} : vector<16x128xbf16>, vector<128x256xbf16>, vector<16x256xf32> -> vector<16x256xf32>
    %67 = arith.addf %61, %66 : vector<16x256xf32>
    %68 = vector.extract_strided_slice %32 {offsets = [6, 0, 0], sizes = [1, 16, 128], strides = [1, 1, 1]} : vector<8x16x128xbf16> to vector<1x16x128xbf16>
    %69 = vector.shape_cast %68 : vector<1x16x128xbf16> to vector<16x128xbf16>
    %c6 = arith.constant 6 : index
    %c0_44 = arith.constant 0 : index
    %c0_45 = arith.constant 0 : index
    %70 = vector.load %arg5[%c6, %c0_44, %c0_45] : memref<8x128x256xbf16, #tpu.memory_space<vmem>>, vector<1x128x256xbf16>
    %71 = vector.shape_cast %70 : vector<1x128x256xbf16> to vector<128x256xbf16>
    %cst_46 = arith.constant dense<0.000000e+00> : vector<16x256xf32>
    %72 = tpu.matmul %69, %71, %cst_46 {dimension_numbers = #tpu.dot_dimension_numbers<[1], [0], [0], [1], [0, 0, 1, 1], [], []>} : vector<16x128xbf16>, vector<128x256xbf16>, vector<16x256xf32> -> vector<16x256xf32>
    %73 = arith.addf %67, %72 : vector<16x256xf32>
    %74 = vector.extract_strided_slice %32 {offsets = [7, 0, 0], sizes = [1, 16, 128], strides = [1, 1, 1]} : vector<8x16x128xbf16> to vector<1x16x128xbf16>
    %75 = vector.shape_cast %74 : vector<1x16x128xbf16> to vector<16x128xbf16>
    %c7 = arith.constant 7 : index
    %c0_47 = arith.constant 0 : index
    %c0_48 = arith.constant 0 : index
    %76 = vector.load %arg5[%c7, %c0_47, %c0_48] : memref<8x128x256xbf16, #tpu.memory_space<vmem>>, vector<1x128x256xbf16>
    %77 = vector.shape_cast %76 : vector<1x128x256xbf16> to vector<128x256xbf16>
    %cst_49 = arith.constant dense<0.000000e+00> : vector<16x256xf32>
    %78 = tpu.matmul %75, %77, %cst_49 {dimension_numbers = #tpu.dot_dimension_numbers<[1], [0], [0], [1], [0, 0, 1, 1], [], []>} : vector<16x128xbf16>, vector<128x256xbf16>, vector<16x256xf32> -> vector<16x256xf32>
    %79 = arith.addf %73, %78 : vector<16x256xf32>
    %c0_50 = arith.constant 0 : index
    %c0_51 = arith.constant 0 : index
    %80 = vector.load %arg6[%c0_50, %c0_51] : memref<1x256xf32, #tpu.memory_space<vmem>>, vector<1x256xf32>
    %81 = vector.broadcast %80 : vector<1x256xf32> to vector<16x256xf32>
    %82 = arith.addf %79, %81 : vector<16x256xf32>
    %83 = vector.extract_strided_slice %82 {offsets = [0, 0], sizes = [16, 128], strides = [1, 1]} : vector<16x256xf32> to vector<16x128xf32>
    %84 = vector.extract_strided_slice %82 {offsets = [0, 128], sizes = [16, 128], strides = [1, 1]} : vector<16x256xf32> to vector<16x128xf32>
    %c0_52 = arith.constant 0 : index
    %c0_53 = arith.constant 0 : index
    %85 = memref.load %arg2[%c0_52, %c0_53] : memref<1x1xf32, #tpu.memory_space<smem>>
    %86 = vector.broadcast %85 : f32 to vector<16x128xf32>
    %87 = arith.mulf %86, %83 : vector<16x128xf32>
    %cst_54 = arith.constant 5.000000e-01 : f32
    %88 = vector.broadcast %cst_54 : f32 to vector<16x128xf32>
    %89 = arith.mulf %88, %84 : vector<16x128xf32>
    %90 = math.exp %89 : vector<16x128xf32>
    %91 = arith.addf %87, %90 : vector<16x128xf32>
    %c0_55 = arith.constant 0 : index
    %c0_56 = arith.constant 0 : index
    %92 = vector.load %arg7[%c0_55, %c0_56] : memref<16x128xf32, #tpu.memory_space<vmem>>, vector<16x128xf32>
    tpu.vector_store %arg7[%c0_55, %c0_56], %91 {strides = array<i32>} : memref<16x128xf32, #tpu.memory_space<vmem>>, vector<16x128xf32>,
    return
  }
  func.func @transform_0(%arg0: i32) -> (i32, i32, i32) {
    %c0_i32 = arith.constant 0 : i32
    %c0_i32_0 = arith.constant 0 : i32
    %c0_i32_1 = arith.constant 0 : i32
    return %c0_i32, %arg0, %c0_i32_0 : i32, i32, i32
  }
  func.func @transform_1(%arg0: i32) -> (i32, i32) {
    %c0_i32 = arith.constant 0 : i32
    %c0_i32_0 = arith.constant 0 : i32
    %c0_i32_1 = arith.constant 0 : i32
    return %c0_i32, %c0_i32_0 : i32, i32
  }
  func.func @transform_2(%arg0: i32) -> (i32, i32, i32) {
    %c0_i32 = arith.constant 0 : i32
    %c0_i32_0 = arith.constant 0 : i32
    %c0_i32_1 = arith.constant 0 : i32
    %c0_i32_2 = arith.constant 0 : i32
    return %c0_i32, %c0_i32_0, %c0_i32_1 : i32, i32, i32
  }
  func.func @transform_3(%arg0: i32) -> (i32, i32, i32) {
    %c0_i32 = arith.constant 0 : i32
    %c0_i32_0 = arith.constant 0 : i32
    %c0_i32_1 = arith.constant 0 : i32
    %c0_i32_2 = arith.constant 0 : i32
    return %c0_i32, %c0_i32_0, %c0_i32_1 : i32, i32, i32
  }
  func.func @transform_4(%arg0: i32) -> (i32, i32, i32) {
    %c0_i32 = arith.constant 0 : i32
    %c0_i32_0 = arith.constant 0 : i32
    %c0_i32_1 = arith.constant 0 : i32
    %c0_i32_2 = arith.constant 0 : i32
    return %c0_i32, %c0_i32_0, %c0_i32_1 : i32, i32, i32
  }
  func.func @transform_5(%arg0: i32) -> (i32, i32) {
    %c0_i32 = arith.constant 0 : i32
    %c0_i32_0 = arith.constant 0 : i32
    %c0_i32_1 = arith.constant 0 : i32
    return %c0_i32, %c0_i32_0 : i32, i32
  }
  func.func @transform_6(%arg0: i32) -> (i32, i32) {
    %c0_i32 = arith.constant 0 : i32
    %c0_i32_0 = arith.constant 0 : i32
    return %arg0, %c0_i32 : i32, i32
  }
}

</mosaic_0001>

<bundles_post_ra>
// kernel: tpu_custom_call.1
= control target key start
LH: loop header
LB: loop body
LE: loop exit
PB: predicated region body
PF: predicated region fallthrough
CT: control target
= control target key end

     0   :  { %12 = vsyncpa [#allocation4], 0  ;;  %s2874_s0 = inlined_call_operand.hbm [shape: bf16[8,16,128], index: 0, kind: input, shape index: {}]   ;;  %s2875_s1 = inlined_call_operand.<no memory space> [shape: f32[1,1], index: 1, kind: input, shape index: {}]   ;;  %s2876_s2 = inlined_call_operand.hbm [shape: bf16[3,128,128], index: 2, kind: input, shape index: {}]   ;;  %s2877_s3 = inlined_call_operand.hbm [shape: f32[3,1,128], index: 3, kind: input, shape index: {}]   ;;  %s2878_s4 = inlined_call_operand.hbm [shape: bf16[8,128,256], index: 4, kind: input, shape index: {}]   ;;  %s2879_s5 = inlined_call_operand.hbm [shape: f32[1,256], index: 5, kind: input, shape index: {}]   ;;  %s2880_s6 = inlined_call_operand.hbm [shape: f32[16,128], index: 6, kind: output, shape index: {}]  }
   0x1   :  { %13 = vsyncpa [#allocation7], 0 }
   0x2   :  { %14 = vsyncpa [#allocation10], 0 }
   0x3   :  { %15 = vsyncpa [#allocation5], 0  ;;  %s2644_s21 = smov [#allocation6]   ;;  %s2645_s23 = smov [#allocation9]  }
   0x4   :  { %s35_s22 = sshll.u32 %s2644_s21, 4  ;;  %s59_s24 = sshll.u32 %s2645_s23, 4  ;;  %s36_s22 = int_to_ptr.vmem [resolvable:$true] %s35_s22  ;;  %s2692_s24 = int_to_ptr.vmem [resolvable:$true] %s59_s24 }
   0x5   :  { %s2504_s27 = scalar_lea.hbm %s2876_s2, 3072 }
   0x6   :  { %p2505_p0 = scmp.ne.s32.totalorder %s2876_s2, %s2504_s27  ;;  %p2508_p1 = scmp.lt.u32.totalorder %s2504_s27, %s2876_s2 }
   0x8   :  { %p2510_p2 = pnand %p2508_p1, %p2505_p0 }
   0xa   :  { %2513 = shalt.err (!%p2510_p2)
}
   0xb   :  { %s2514_s8 = scalar_lea.vmem %s36_s22, 3072  ;;  %p2519_p4 = scmp.lt.s32.totalorder %s36_s22, %s36_s22 }
   0xc   :  { %p2515_p3 = scmp.ne.s32.totalorder %s36_s22, %s2514_s8  ;;  %p2520_p5 = scmp.lt.s32.totalorder %s2514_s8, %s2514_s8 }
   0xe   :  { %p2521_p6 = por %p2520_p5, %p2519_p4 }
  0x10   :  { %p2522_p7 = pnand %p2521_p6, %p2515_p3 }
  0x12   :  { %2525 = shalt.err (!%p2522_p7)
}
  0x13   :  { %s2646_s9 = smov 64   ;;  %s2647_s10 = smov 4  }
  0x14   :  { %41 = dma.hbm_to_vmem [thread:$0]  %s2876_s2, 3072, %s36_s22, [#allocation7], %s2646_s9, %s2646_s9, %s2647_s10  }
  0x15   :  { %s2526_s15 = scalar_lea.hbm %s2878_s4, 16384 }
  0x16   :  { %p2527_p8 = scmp.ne.s32.totalorder %s2878_s4, %s2526_s15  ;;  %p2530_p9 = scmp.lt.u32.totalorder %s2526_s15, %s2878_s4 }
  0x18   :  { %p2532_p10 = pnand %p2530_p9, %p2527_p8 }
  0x1a   :  { %2535 = shalt.err (!%p2532_p10)
}
  0x1b   :  { %s2536_s20 = scalar_lea.vmem %s2692_s24, 16384  ;;  %p2541_p12 = scmp.lt.s32.totalorder %s2692_s24, %s2692_s24 }
  0x1c   :  { %p2537_p11 = scmp.ne.s32.totalorder %s2692_s24, %s2536_s20  ;;  %p2542_p13 = scmp.lt.s32.totalorder %s2536_s20, %s2536_s20 }
  0x1e   :  { %p2543_p0 = por %p2542_p13, %p2541_p12 }
  0x20   :  { %p2544_p1 = pnand %p2543_p0, %p2537_p11 }
  0x22   :  { %2547 = shalt.err (!%p2544_p1)
}
  0x23   :  { %s2648_s2 = smov 128   ;;  %s2649_s21 = smov 8  }
  0x24   :  { %65 = dma.hbm_to_vmem [thread:$0]  %s2878_s4, 16384, %s2692_s24, [#allocation10], %s2648_s2, %s2648_s2, %s2649_s21  }
  0x25   :  { %s2650_s25 = smov [#allocation3]   ;;  %s2651_s27 = smov [#allocation8]  }
  0x26   :  { %s21_s26 = sshll.u32 %s2650_s25, 4  ;;  %s47_s28 = sshll.u32 %s2651_s27, 4  ;;  %s22_s26 = int_to_ptr.vmem [resolvable:$true] %s21_s26  ;;  %s2729_s28 = int_to_ptr.vmem [resolvable:$true] %s47_s28 }
  0x27   :  { %s2548_s7 = scalar_lea.hbm %s2874_s0, 1024 }
  0x28   :  { %p2549_p2 = scmp.ne.s32.totalorder %s2874_s0, %s2548_s7  ;;  %p2552_p3 = scmp.lt.u32.totalorder %s2548_s7, %s2874_s0 }
  0x2a   :  { %p2554_p4 = pnand %p2552_p3, %p2549_p2 }
  0x2c   :  { %2557 = shalt.err (!%p2554_p4)
}
  0x2d   :  { %s2558_s4 = scalar_lea.vmem %s22_s26, 1024  ;;  %p2563_p6 = scmp.lt.s32.totalorder %s22_s26, %s22_s26 }
  0x2e   :  { %p2559_p5 = scmp.ne.s32.totalorder %s22_s26, %s2558_s4  ;;  %p2564_p7 = scmp.lt.s32.totalorder %s2558_s4, %s2558_s4 }
  0x30   :  { %p2565_p8 = por %p2564_p7, %p2563_p6 }
  0x32   :  { %p2566_p9 = pnand %p2565_p8, %p2559_p5 }
  0x34   :  { %2569 = shalt.err (!%p2566_p9)
}
  0x35   :  { %27 = dma.hbm_to_vmem [thread:$0]  %s2874_s0, 1024, %s22_s26, [#allocation4], %s2646_s9, %s2646_s9, %s2647_s10  }
  0x36   :  { %s2570_s17 = scalar_lea.hbm %s2877_s3, 48 }
  0x37   :  { %p2571_p10 = scmp.ne.s32.totalorder %s2877_s3, %s2570_s17  ;;  %p2574_p11 = scmp.lt.u32.totalorder %s2570_s17, %s2877_s3 }
  0x39   :  { %p2576_p12 = pnand %p2574_p11, %p2571_p10 }
  0x3b   :  { %2579 = shalt.err (!%p2576_p12)
}
  0x3c   :  { %s2580_s23 = scalar_lea.vmem %s2729_s28, 48  ;;  %s2584_s0 = scalar_lea.vmem %s2729_s28, 64 }
  0x3d   :  { %p2581_p13 = scmp.ne.s32.totalorder %s2729_s28, %s2580_s23  ;;  %p2585_p0 = scmp.lt.s32.totalorder %s2729_s28, %s2729_s28 }
  0x3e   :  { %p2586_p1 = scmp.lt.s32.totalorder %s2584_s0, %s2580_s23 }
  0x40   :  { %p2587_p2 = por %p2586_p1, %p2585_p0 }
  0x42   :  { %p2588_p3 = pnand %p2587_p2, %p2581_p13 }
  0x44   :  { %2591 = shalt.err (!%p2588_p3)
}
  0x45   :  { %s2652_s9 = smov 16   ;;  %s2653_s10 = smov 1  }
  0x46   :  { %53 = dma.hbm_to_vmem [thread:$0]  %s2877_s3, 48, %s2729_s28, [#allocation7], %s2652_s9, %s2652_s9, %s2653_s10  }
  0x47   :  { %s2654_s27 = smov [#allocation11]   ;;  %s2592_s8 = scalar_lea.hbm %s2879_s5, 32 }
  0x48   :  { %s72_s29 = sshll.u32 %s2654_s27, 4  ;;  %p2593_p4 = scmp.ne.s32.totalorder %s2879_s5, %s2592_s8  ;;  %s73_s29 = int_to_ptr.vmem [resolvable:$true] %s72_s29 }
  0x49   :  { %p2596_p5 = scmp.lt.u32.totalorder %s2592_s8, %s2879_s5 }
  0x4b   :  { %p2598_p6 = pnand %p2596_p5, %p2593_p4 }
  0x4d   :  { %2601 = shalt.err (!%p2598_p6)
}
  0x4e   :  { %s2602_s24 = scalar_lea.vmem %s73_s29, 32  ;;  %p2607_p8 = scmp.lt.s32.totalorder %s73_s29, %s73_s29 }
  0x4f   :  { %p2603_p7 = scmp.ne.s32.totalorder %s73_s29, %s2602_s24  ;;  %p2608_p9 = scmp.lt.s32.totalorder %s2602_s24, %s2602_s24 }
  0x51   :  { %p2609_p10 = por %p2608_p9, %p2607_p8 }
  0x53   :  { %p2610_p11 = pnand %p2609_p10, %p2603_p7 }
  0x55   :  { %2613 = shalt.err (!%p2610_p11)
}
  0x56   :  { %75 = dma.hbm_to_vmem [thread:$0]  %s2879_s5, 32, %s73_s29, [#allocation10]  }
  0x57   :  { %2636 = dma.done.wait [#allocation4], 1024  }
  0x58   :  { %2637 = vsyncadd [#allocation4], 4294966272 }
  0x59   :  { %2638 = dma.done.wait [#allocation7], 3120  }
  0x5a   :  { %2639 = vsyncadd [#allocation7], 4294964176 }
  0x5b   :  { %2640 = dma.done.wait [#allocation10], 16416  }
  0x5c   :  { %2641 = vsyncadd [#allocation10], 4294950880  ;;  %v2276_v0 = vld [vmem:[#allocation6] sm:$0xff]   ;;  %v2277_v1 = vld [vmem:[#allocation6 + $0x8] sm:$0xff]   ;;  %s2656_s15 = smov [#allocation12]  }
  0x5d   :  { %2139 = vmatprep.subr.bf16.mxu0 %v2276_v0  ;;  %v2278_v2 = vld [vmem:[#allocation6 + $0x10] sm:$0xff]   ;;  %v2279_v3 = vld [vmem:[#allocation6 + $0x18] sm:$0xff]   ;;  %v2284_v4 = vld [vmem:[#allocation3] sm:$0xff]   ;;  %s1914_s16 = sshll.u32 %s2656_s15, 4  ;;  %s1915_s16 = int_to_ptr.vmem [resolvable:$true] %s1914_s16 }
  0x5e   :  { %2140 = vmatpush3.bf16.msra.mxu0 %v2276_v0  ;;  %2155 = vmatprep.mubr.bf16.mxu0 %v2284_v4  ;;  %v2280_v5 = vld [vmem:[#allocation6 + $0x20] sm:$0xff]   ;;  %v2281_v6 = vld [vmem:[#allocation6 + $0x28] sm:$0xff]   ;;  %v2282_v7 = vld [vmem:[#allocation6 + $0x30] sm:$0xff]   ;;  %s2614_s17 = scalar_lea.vmem %s1915_s16, 256  ;;  %p2619_p13 = scmp.lt.s32.totalorder %s1915_s16, %s1915_s16 }
  0x5f   :  { %2141 = vmatprep.subr.bf16.mxu0 %v2277_v1  ;;  %v2283_v8 = vld [vmem:[#allocation6 + $0x38] sm:$0xff]   ;;  %v2292_v9 = vld [vmem:[#allocation6 + $0x40] sm:$0xff]   ;;  %v2285_v10 = vld [vmem:[#allocation3 + $0x8] sm:$0xff]   ;;  %p2615_p12 = scmp.ne.s32.totalorder %s1915_s16, %s2614_s17  ;;  %p2620_p0 = scmp.lt.s32.totalorder %s2614_s17, %s2614_s17 }
  0x60   :  { %v2286_v11 = vld [vmem:[#allocation3 + $0x10] sm:$0xff]   ;;  %v2293_v12 = vld [vmem:[#allocation6 + $0x48] sm:$0xff]   ;;  %v2287_v14 = vld [vmem:[#allocation3 + $0x18] sm:$0xff]  }
  0x61   :  { %v2294_v13 = vld [vmem:[#allocation6 + $0x50] sm:$0xff]   ;;  %v2288_v15 = vld [vmem:[#allocation3 + $0x20] sm:$0xff]   ;;  %v2295_v16 = vld [vmem:[#allocation6 + $0x58] sm:$0xff]   ;;  %p2621_p1 = por %p2620_p0, %p2619_p13 }
  0x62   :  { %2142 = vmatpush3.bf16.msra.mxu0 %v2277_v1  ;;  %v2296_v17 = vld [vmem:[#allocation6 + $0x60] sm:$0xff]   ;;  %v2289_v18 = vld [vmem:[#allocation3 + $0x28] sm:$0xff]   ;;  %v2290_v19 = vld [vmem:[#allocation3 + $0x30] sm:$0xff]  }
  0x63   :  { %2143 = vmatprep.subr.bf16.mxu0 %v2278_v2  ;;  %v2297_v20 = vld [vmem:[#allocation6 + $0x68] sm:$0xff]   ;;  %v2291_v21 = vld [vmem:[#allocation3 + $0x38] sm:$0xff]   ;;  %v2298_v22 = vld [vmem:[#allocation6 + $0x70] sm:$0xff]   ;;  %p2622_p2 = pnand %p2621_p1, %p2615_p12 }
  0x64   :  { %v2299_v23 = vld [vmem:[#allocation6 + $0x78] sm:$0xff]   ;;  %v2300_v24 = vld [vmem:[#allocation6 + $0x80] sm:$0xff]   ;;  %v2301_v43 = vld [vmem:[#allocation6 + $0x88] sm:$0xff]  }
  0x65   :  { %v2776_v25 = vld [vmem:[#allocation8] ss:$0 sm:$0xff]  ;;  %v2302_v51 = vld [vmem:[#allocation6 + $0x90] sm:$0xff]   ;;  %v2303_v59 = vld [vmem:[#allocation6 + $0x98] sm:$0xff]  }
  0x66   :  { %2144 = vmatpush3.bf16.msra.mxu0 %v2278_v2  ;;  %v2304_v4 = vld [vmem:[#allocation6 + $0xa0] sm:$0xff]  }
  0x67   :  { %2145 = vmatprep.subr.bf16.mxu0 %v2279_v3 }
  0x6a   :  { %2146 = vmatpush3.bf16.msra.mxu0 %v2279_v3 }
  0x6b   :  { %2147 = vmatprep.subr.bf16.mxu0 %v2280_v5 }
  0x6e   :  { %2148 = vmatpush3.bf16.msra.mxu0 %v2280_v5 }
  0x6f   :  { %2149 = vmatprep.subr.bf16.mxu0 %v2281_v6 }
  0x72   :  { %2150 = vmatpush3.bf16.msra.mxu0 %v2281_v6 }
  0x73   :  { %2151 = vmatprep.subr.bf16.mxu0 %v2282_v7 }
  0x76   :  { %2152 = vmatpush3.bf16.msra.mxu0 %v2282_v7 }
  0x77   :  { %2153 = vmatprep.subr.bf16.mxu0 %v2283_v8 }
  0x7a   :  { %2154 = vmatpush3.bf16.msra.mxu0 %v2283_v8 }
  0x7b   :  { %2171 = vmatprep.subr.bf16.mxu0 %v2292_v9 }
  0x7d   :  { %2156 = vmatmul.mubr.bf16.vlgmr.msra.gmra.mrb[0].mxu0 %v2285_v10 }
  0x7e   :  { %2159 = vmatprep.mubr.bf16.mxu0 %v2286_v11  ;;  %2172 = vmatpush3.bf16.msra.mxu0 %v2292_v9  ;;  %v2305_v11 = vld [vmem:[#allocation6 + $0xa8] sm:$0xff]  }
  0x7f   :  { %2173 = vmatprep.subr.bf16.mxu0 %v2293_v12 }
  0x82   :  { %2174 = vmatpush3.bf16.msra.mxu0 %v2293_v12 }
  0x83   :  { %2175 = vmatprep.subr.bf16.mxu0 %v2294_v13 }
  0x85   :  { %2160 = vmatmul.mubr.bf16.gmra.mrb[4].mxu0 %v2287_v14 }
  0x86   :  { %2163 = vmatprep.mubr.bf16.mxu0 %v2288_v15  ;;  %2176 = vmatpush3.bf16.msra.mxu0 %v2294_v13 }
  0x87   :  { %2177 = vmatprep.subr.bf16.mxu0 %v2295_v16 }
  0x8a   :  { %2178 = vmatpush3.bf16.msra.mxu0 %v2295_v16 }
  0x8b   :  { %2179 = vmatprep.subr.bf16.mxu0 %v2296_v17 }
  0x8d   :  { %2164 = vmatmul.mubr.bf16.gmra.mrb[8].mxu0 %v2289_v18 }
  0x8e   :  { %2167 = vmatprep.mubr.bf16.mxu0 %v2290_v19  ;;  %2180 = vmatpush3.bf16.msra.mxu0 %v2296_v17 }
  0x8f   :  { %2181 = vmatprep.subr.bf16.mxu0 %v2297_v20 }
  0x92   :  { %2182 = vmatpush3.bf16.msra.mxu0 %v2297_v20 }
  0x93   :  { %2183 = vmatprep.subr.bf16.mxu0 %v2298_v22 }
  0x95   :  { %2168 = vmatmul.mubr.bf16.gmra.mrb[12].mxu0 %v2291_v21 }
  0x96   :  { %2184 = vmatpush3.bf16.msra.mxu0 %v2298_v22 }
  0x97   :  { %2185 = vmatprep.subr.bf16.mxu0 %v2299_v23 }
  0x9a   :  { %2186 = vmatpush3.bf16.msra.mxu0 %v2299_v23  ;;  %v2306_v23 = vld [vmem:[#allocation6 + $0xb0] sm:$0xff]  }
  0x9b   :  { %2203 = vmatprep.subr.bf16.mxu0 %v2300_v24 }
 0x150   :  { %v2157_v26 = vpop.f32.mrb[0].mxu0 }
 0x151   :  { %v270_v27 = vadd.f32 %v2157_v26, %v2776_v25  ;;  %v261_v28 = vpop.f32.mrb[1].mxu0  ;;  %v2310_v26 = vld [vmem:[#allocation9 + $0x84] ss:$8 sps:$4 sm:$0xff]  }
 0x152   :  { %v262_v29 = vadd.f32 %v2776_v25, %v261_v28  ;;  %v2158_v30 = vpop.f32.mrb[2].mxu0  ;;  %v2319_v28 = vld [vmem:[#allocation9 + $0x100] ss:$8 sps:$4 sm:$0xff]  }
 0x153   :  { %v273_v31 = vadd.f32 %v2158_v30, %v2776_v25  ;;  %v264_v32 = vpop.f32.mrb[3].mxu0  ;;  %v326_v34 = vmax.f32 %v270_v27, 0.0  ;;  %v2317_v27 = vld [vmem:[#allocation9 + $0x104] ss:$8 sps:$4 sm:$0xff]  }
 0x154   :  { %v265_v33 = vadd.f32 %v2776_v25, %v264_v32  ;;  %v324_v36 = vmax.f32 %v262_v29, 0.0  ;;  %1112 = vmatprep.subr.bf16.mxu1 %v2317_v27  ;;  %v2325_v29 = vld [vmem:[#allocation9 + $0x110] ss:$8 sps:$4 sm:$0xff]   ;;  %v2329_v30 = vld [vmem:[#allocation9 + $0x124] ss:$8 sps:$4 sm:$0xff]  }
 0x155   :  { %v327_v35 = vmax.f32 %v273_v31, 0.0  ;;  %1113 = vmatpush1.bf16.msra.mxu1 %v2319_v28  ;;  %v2331_v31 = vld [vmem:[#allocation9 + $0x120] ss:$8 sps:$4 sm:$0xff]   ;;  %v2335_v32 = vld [vmem:[#allocation9 + $0x134] ss:$8 sps:$4 sm:$0xff]  }
 0x156   :  { %v325_v37 = vmax.f32 %v265_v33, 0.0  ;;  %v2337_v33 = vld [vmem:[#allocation9 + $0x130] ss:$8 sps:$4 sm:$0xff]  }
 0x157   :  { %v341_v38 = vpack.c.bf16 %v327_v35, %v326_v34  ;;  %v2794_v34 = vld [vmem:[#allocation8 + $0x1] ss:$0 sm:$0xff] }
 0x158   :  { %v340_v39 = vpack.c.bf16 %v325_v37, %v324_v36  ;;  %v2161_v40 = vpop.f32.mrb[4].mxu0 }
 0x159   :  { %v286_v41 = vadd.f32 %v2161_v40, %v2776_v25  ;;  %v277_v42 = vpop.f32.mrb[5].mxu0 }
 0x15a   :  { %v278_v44 = vadd.f32 %v2776_v25, %v277_v42  ;;  %v2162_v45 = vpop.f32.mrb[6].mxu0  ;;  %2187 = vmatprep.mubr.bf16.mxu0 %v340_v39 }
 0x15b   :  { %v289_v46 = vadd.f32 %v2162_v45, %v2776_v25  ;;  %v280_v47 = vpop.f32.mrb[7].mxu0  ;;  %2188 = vmatmul.mubr.bf16.vlgmr.msra.gmra.mrb[16].mxu0 %v341_v38  ;;  %v330_v49 = vmax.f32 %v286_v41, 0.0 }
 0x15c   :  { %v281_v48 = vadd.f32 %v2776_v25, %v280_v47  ;;  %2204 = vmatpush3.bf16.msra.mxu0 %v2300_v24  ;;  %v328_v52 = vmax.f32 %v278_v44, 0.0  ;;  %v2307_v24 = vld [vmem:[#allocation6 + $0xb8] sm:$0xff]  }
 0x15d   :  { %v331_v50 = vmax.f32 %v289_v46, 0.0  ;;  %2205 = vmatprep.subr.bf16.mxu0 %v2301_v43 }
 0x15e   :  { %v329_v53 = vmax.f32 %v281_v48, 0.0 }
 0x15f   :  { %v343_v54 = vpack.c.bf16 %v331_v50, %v330_v49  ;;  %v2308_v50 = vld [vmem:[#allocation9 + $0x80] ss:$8 sps:$4 sm:$0xff]  }
 0x160   :  { %v342_v55 = vpack.c.bf16 %v329_v53, %v328_v52  ;;  %v2165_v56 = vpop.f32.mrb[8].mxu0  ;;  %2206 = vmatpush3.bf16.msra.mxu0 %v2301_v43  ;;  %v2313_v53 = vld [vmem:[#allocation9 + $0x94] ss:$8 sps:$4 sm:$0xff]  }
 0x161   :  { %v302_v57 = vadd.f32 %v2165_v56, %v2776_v25  ;;  %v293_v58 = vpop.f32.mrb[9].mxu0  ;;  %2207 = vmatprep.subr.bf16.mxu0 %v2302_v51 }
 0x162   :  { %2191 = vmatprep.mubr.bf16.mxu0 %v342_v55  ;;  %v294_v60 = vadd.f32 %v2776_v25, %v293_v58  ;;  %v2166_v61 = vpop.f32.mrb[10].mxu0 }
 0x163   :  { %2192 = vmatmul.mubr.bf16.gmra.mrb[20].mxu0 %v343_v54  ;;  %v334_v62 = vmax.f32 %v302_v57, 0.0  ;;  %v305_v63 = vadd.f32 %v2166_v61, %v2776_v25  ;;  %v296_v0 = vpop.f32.mrb[11].mxu0 }
 0x164   :  { %v332_v1 = vmax.f32 %v294_v60, 0.0  ;;  %v297_v2 = vadd.f32 %v2776_v25, %v296_v0  ;;  %2208 = vmatpush3.bf16.msra.mxu0 %v2302_v51 }
 0x165   :  { %v335_v3 = vmax.f32 %v305_v63, 0.0  ;;  %2209 = vmatprep.subr.bf16.mxu0 %v2303_v59 }
 0x166   :  { %v333_v5 = vmax.f32 %v297_v2, 0.0 }
 0x167   :  { %v345_v6 = vpack.c.bf16 %v335_v3, %v334_v62  ;;  %v2316_v62 = vld [vmem:[#allocation9 + $0xa4] ss:$8 sps:$4 sm:$0xff]  }
 0x168   :  { %v344_v7 = vpack.c.bf16 %v333_v5, %v332_v1  ;;  %v2169_v8 = vpop.f32.mrb[12].mxu0  ;;  %2210 = vmatpush3.bf16.msra.mxu0 %v2303_v59  ;;  %v2311_v59 = vld [vmem:[#allocation9 + $0x90] ss:$8 sps:$4 sm:$0xff]  }
 0x169   :  { %v318_v9 = vadd.f32 %v2169_v8, %v2776_v25  ;;  %v309_v10 = vpop.f32.mrb[13].mxu0  ;;  %2211 = vmatprep.subr.bf16.mxu0 %v2304_v4 }
 0x16a   :  { %2195 = vmatprep.mubr.bf16.mxu0 %v344_v7  ;;  %v310_v12 = vadd.f32 %v2776_v25, %v309_v10  ;;  %v2170_v13 = vpop.f32.mrb[14].mxu0  ;;  %v2322_v7 = vld [vmem:[#allocation9 + $0xb4] ss:$8 sps:$4 sm:$0xff]  }
 0x16b   :  { %2196 = vmatmul.mubr.bf16.gmra.mrb[24].mxu0 %v345_v6  ;;  %v338_v14 = vmax.f32 %v318_v9, 0.0  ;;  %v321_v15 = vadd.f32 %v2170_v13, %v2776_v25  ;;  %v312_v16 = vpop.f32.mrb[15].mxu0 }
 0x16c   :  { %v336_v17 = vmax.f32 %v310_v12, 0.0  ;;  %v313_v18 = vadd.f32 %v2776_v25, %v312_v16  ;;  %2212 = vmatpush3.bf16.msra.mxu0 %v2304_v4  ;;  %v2323_v25 = vld [vmem:[#allocation9 + $0x114] ss:$8 sps:$4 sm:$0xff]   ;;  %v2314_v4 = vld [vmem:[#allocation9 + $0xa0] ss:$8 sps:$4 sm:$0xff]  }
 0x16d   :  { %v339_v19 = vmax.f32 %v321_v15, 0.0  ;;  %2213 = vmatprep.subr.bf16.mxu0 %v2305_v11  ;;  %1114 = vmatprep.subr.bf16.mxu1 %v2323_v25  ;;  %v2320_v15 = vld [vmem:[#allocation9 + $0xb0] ss:$8 sps:$4 sm:$0xff]  }
 0x16e   :  { %v337_v20 = vmax.f32 %v313_v18, 0.0  ;;  %1115 = vmatpush1.bf16.msra.mxu1 %v2325_v29 }
 0x16f   :  { %v347_v21 = vpack.c.bf16 %v339_v19, %v338_v14  ;;  %1116 = vmatprep.subr.bf16.mxu1 %v2329_v30 }
 0x170   :  { %v346_v22 = vpack.c.bf16 %v337_v20, %v336_v17  ;;  %2214 = vmatpush3.bf16.msra.mxu0 %v2305_v11  ;;  %v2328_v17 = vld [vmem:[#allocation9 + $0xc4] ss:$8 sps:$4 sm:$0xff]  }
 0x171   :  { %2215 = vmatprep.subr.bf16.mxu0 %v2306_v23 }
 0x172   :  { %2199 = vmatprep.mubr.bf16.mxu0 %v346_v22  ;;  %1117 = vmatpush1.bf16.msra.mxu1 %v2331_v31  ;;  %v2326_v22 = vld [vmem:[#allocation9 + $0xc0] ss:$8 sps:$4 sm:$0xff]  }
 0x173   :  { %2200 = vmatmul.mubr.bf16.gmra.mrb[28].mxu0 %v347_v21  ;;  %1118 = vmatprep.subr.bf16.mxu1 %v2335_v32 }
 0x174   :  { %2216 = vmatpush3.bf16.msra.mxu0 %v2306_v23 }
 0x175   :  { %2217 = vmatprep.subr.bf16.mxu0 %v2307_v24 }
 0x176   :  { %1119 = vmatpush1.bf16.msra.mxu1 %v2337_v33  ;;  %v2332_v33 = vld [vmem:[#allocation9 + $0xd0] ss:$8 sps:$4 sm:$0xff]  }
 0x178   :  { %2218 = vmatpush3.bf16.msra.mxu0 %v2307_v24 }
 0x179   :  { %849 = vmatprep.subr.bf16.mxu0 %v2310_v26  ;;  %v2334_v26 = vld [vmem:[#allocation9 + $0xd4] ss:$8 sps:$4 sm:$0xff]  }
 0x22e   :  { %v2189_v35 = vpop.f32.mrb[16].mxu0 }
 0x22f   :  { %v464_v36 = vadd.f32 %v2189_v35, %v2794_v34  ;;  %v455_v37 = vpop.f32.mrb[17].mxu0 }
 0x230   :  { %v456_v38 = vadd.f32 %v2794_v34, %v455_v37  ;;  %v2190_v39 = vpop.f32.mrb[18].mxu0 }
 0x231   :  { %v467_v40 = vadd.f32 %v2190_v39, %v2794_v34  ;;  %v458_v41 = vpop.f32.mrb[19].mxu0  ;;  %v520_v43 = vmax.f32 %v464_v36, 0.0  ;;  %v2340_v39 = vld [vmem:[#allocation9 + $0xe4] ss:$8 sps:$4 sm:$0xff]  }
 0x232   :  { %v459_v42 = vadd.f32 %v2794_v34, %v458_v41  ;;  %v518_v45 = vmax.f32 %v456_v38, 0.0  ;;  %v2341_v41 = vld [vmem:[#allocation9 + $0x144] ss:$8 sps:$4 sm:$0xff]  }
 0x233   :  { %v521_v44 = vmax.f32 %v467_v40, 0.0  ;;  %v2338_v40 = vld [vmem:[#allocation9 + $0xe0] ss:$8 sps:$4 sm:$0xff]   ;;  %1120 = vmatprep.subr.bf16.mxu1 %v2341_v41 }
 0x234   :  { %v519_v46 = vmax.f32 %v459_v42, 0.0  ;;  %v2343_v42 = vld [vmem:[#allocation9 + $0x140] ss:$8 sps:$4 sm:$0xff]  }
 0x235   :  { %v535_v47 = vpack.c.bf16 %v521_v44, %v520_v43  ;;  %1121 = vmatpush1.bf16.msra.mxu1 %v2343_v42  ;;  %v2346_v43 = vld [vmem:[#allocation9 + $0xf4] ss:$8 sps:$4 sm:$0xff]   ;;  %v2374_v42 = vld [vmem:[#allocation9 + $0x40] ss:$8 sps:$4 sm:$0xff]  }
 0x236   :  { %v534_v48 = vpack.c.bf16 %v519_v46, %v518_v45  ;;  %v2193_v49 = vpop.f32.mrb[20].mxu0  ;;  %v2347_v44 = vld [vmem:[#allocation9 + $0x154] ss:$8 sps:$4 sm:$0xff]   ;;  %v2349_v45 = vld [vmem:[#allocation9 + $0x150] ss:$8 sps:$4 sm:$0xff]  }
 0x237   :  { %v480_v51 = vadd.f32 %v2193_v49, %v2794_v34  ;;  %v471_v52 = vpop.f32.mrb[21].mxu0  ;;  %1122 = vmatprep.subr.bf16.mxu1 %v2347_v44  ;;  %v2352_v46 = vld [vmem:[#allocation9 + $0x4] ss:$8 sps:$4 sm:$0xff]   ;;  %v2355_v49 = vld [vmem:[#allocation9 + $0x160] ss:$8 sps:$4 sm:$0xff]  }
 0x238   :  { %v472_v54 = vadd.f32 %v2794_v34, %v471_v52  ;;  %v2194_v55 = vpop.f32.mrb[22].mxu0  ;;  %2219 = vmatprep.mubr.bf16.mxu0 %v534_v48  ;;  %v2353_v48 = vld [vmem:[#allocation9 + $0x164] ss:$8 sps:$4 sm:$0xff]   ;;  %v2382_v44 = vld [vmem:[#allocation9 + $0x54] ss:$8 sps:$4 sm:$0xff]  }
 0x239   :  { %v483_v56 = vadd.f32 %v2194_v55, %v2794_v34  ;;  %v474_v57 = vpop.f32.mrb[23].mxu0  ;;  %2220 = vmatmul.mubr.bf16.vlgmr.msra.gmra.mrb[32].mxu0 %v535_v47  ;;  %v524_v60 = vmax.f32 %v480_v51, 0.0  ;;  %1123 = vmatpush1.bf16.msra.mxu1 %v2349_v45  ;;  %v2655_v47 = vmov 0   ;;  %v2361_v51 = vld [vmem:[#allocation9 + $0x170] ss:$8 sps:$4 sm:$0xff]  }
 0x23a   :  { %v475_v58 = vadd.f32 %v2794_v34, %v474_v57  ;;  %850 = vmatpush1.bf16.msra.mxu0 %v2308_v50  ;;  %v522_v63 = vmax.f32 %v472_v54, 0.0  ;;  %1144 = vmatprep.mubr.bf16.mxu1 %v2655_v47  ;;  %v2359_v50 = vld [vmem:[#allocation9 + $0x174] ss:$8 sps:$4 sm:$0xff]   ;;  %v2367_v52 = vld [vmem:[#allocation9 + $0x184] ss:$8 sps:$4 sm:$0xff]  }
 0x23b   :  { %v525_v61 = vmax.f32 %v483_v56, 0.0  ;;  %851 = vmatprep.subr.bf16.mxu0 %v2313_v53  ;;  %1124 = vmatprep.subr.bf16.mxu1 %v2353_v48  ;;  %v2814_v53 = vld [vmem:[#allocation8 + $0x2] ss:$0 sm:$0xff] }
 0x23c   :  { %v523_v0 = vmax.f32 %v475_v58, 0.0 }
 0x23d   :  { %v537_v1 = vpack.c.bf16 %v525_v61, %v524_v60  ;;  %1125 = vmatpush1.bf16.msra.mxu1 %v2355_v49 }
 0x23e   :  { %v536_v2 = vpack.c.bf16 %v523_v0, %v522_v63  ;;  %v2197_v3 = vpop.f32.mrb[24].mxu0  ;;  %852 = vmatpush1.bf16.msra.mxu0 %v2311_v59  ;;  %1126 = vmatprep.subr.bf16.mxu1 %v2359_v50 }
 0x23f   :  { %v496_v5 = vadd.f32 %v2197_v3, %v2794_v34  ;;  %v487_v6 = vpop.f32.mrb[25].mxu0  ;;  %853 = vmatprep.subr.bf16.mxu0 %v2316_v62 }
 0x240   :  { %2223 = vmatprep.mubr.bf16.mxu0 %v536_v2  ;;  %v488_v8 = vadd.f32 %v2794_v34, %v487_v6  ;;  %v2198_v9 = vpop.f32.mrb[26].mxu0  ;;  %v2350_v2 = vld [vmem:[#allocation9] ss:$8 sps:$4 sm:$0xff]  }
 0x241   :  { %2224 = vmatmul.mubr.bf16.gmra.mrb[36].mxu0 %v537_v1  ;;  %v528_v10 = vmax.f32 %v496_v5, 0.0  ;;  %v499_v11 = vadd.f32 %v2198_v9, %v2794_v34  ;;  %v490_v12 = vpop.f32.mrb[27].mxu0  ;;  %1127 = vmatpush1.bf16.msra.mxu1 %v2361_v51 }
 0x242   :  { %v526_v13 = vmax.f32 %v488_v8, 0.0  ;;  %v491_v14 = vadd.f32 %v2794_v34, %v490_v12  ;;  %854 = vmatpush1.bf16.msra.mxu0 %v2314_v4  ;;  %1256 = vmatprep.subr.bf16.mxu1 %v2367_v52  ;;  %v2358_v4 = vld [vmem:[#allocation9 + $0x14] ss:$8 sps:$4 sm:$0xff]   ;;  %v2380_v52 = vld [vmem:[#allocation9 + $0x50] ss:$8 sps:$4 sm:$0xff]  }
 0x243   :  { %v529_v16 = vmax.f32 %v499_v11, 0.0  ;;  %855 = vmatprep.subr.bf16.mxu0 %v2322_v7  ;;  %v2356_v11 = vld [vmem:[#allocation9 + $0x10] ss:$8 sps:$4 sm:$0xff]  }
 0x244   :  { %v527_v18 = vmax.f32 %v491_v14, 0.0  ;;  %v2364_v14 = vld [vmem:[#allocation9 + $0x24] ss:$8 sps:$4 sm:$0xff]  }
 0x245   :  { %v539_v19 = vpack.c.bf16 %v529_v16, %v528_v10 }
 0x246   :  { %v538_v20 = vpack.c.bf16 %v527_v18, %v526_v13  ;;  %v2201_v21 = vpop.f32.mrb[28].mxu0  ;;  %856 = vmatpush1.bf16.msra.mxu0 %v2320_v15 }
 0x247   :  { %v512_v23 = vadd.f32 %v2201_v21, %v2794_v34  ;;  %v503_v24 = vpop.f32.mrb[29].mxu0  ;;  %857 = vmatprep.subr.bf16.mxu0 %v2328_v17 }
 0x248   :  { %2227 = vmatprep.mubr.bf16.mxu0 %v538_v20  ;;  %v504_v27 = vadd.f32 %v2794_v34, %v503_v24  ;;  %v2202_v28 = vpop.f32.mrb[30].mxu0  ;;  %v2362_v20 = vld [vmem:[#allocation9 + $0x20] ss:$8 sps:$4 sm:$0xff]  }
 0x249   :  { %2228 = vmatmul.mubr.bf16.gmra.mrb[40].mxu0 %v539_v19  ;;  %v532_v25 = vmax.f32 %v512_v23, 0.0  ;;  %v515_v29 = vadd.f32 %v2202_v28, %v2794_v34  ;;  %v506_v30 = vpop.f32.mrb[31].mxu0  ;;  %v2370_v23 = vld [vmem:[#allocation9 + $0x34] ss:$8 sps:$4 sm:$0xff]  }
 0x24a   :  { %v530_v31 = vmax.f32 %v504_v27, 0.0  ;;  %v507_v32 = vadd.f32 %v2794_v34, %v506_v30  ;;  %858 = vmatpush1.bf16.msra.mxu0 %v2326_v22  ;;  %v2344_v34 = vld [vmem:[#allocation9 + $0xf0] ss:$8 sps:$4 sm:$0xff]   ;;  %v2365_v22 = vld [vmem:[#allocation9 + $0x180] ss:$8 sps:$4 sm:$0xff]  }
 0x24b   :  { %v533_v35 = vmax.f32 %v515_v29, 0.0  ;;  %859 = vmatprep.subr.bf16.mxu0 %v2334_v26  ;;  %v2373_v26 = vld [vmem:[#allocation9 + $0x194] ss:$8 sps:$4 sm:$0xff]   ;;  %v2368_v29 = vld [vmem:[#allocation9 + $0x30] ss:$8 sps:$4 sm:$0xff]  }
 0x24c   :  { %v531_v36 = vmax.f32 %v507_v32, 0.0  ;;  %v2371_v32 = vld [vmem:[#allocation9 + $0x190] ss:$8 sps:$4 sm:$0xff]  }
 0x24d   :  { %v541_v37 = vpack.c.bf16 %v533_v35, %v532_v25 }
 0x24e   :  { %v540_v38 = vpack.c.bf16 %v531_v36, %v530_v31  ;;  %860 = vmatpush1.bf16.msra.mxu0 %v2332_v33  ;;  %v2376_v33 = vld [vmem:[#allocation9 + $0x44] ss:$8 sps:$4 sm:$0xff]  }
 0x24f   :  { %861 = vmatprep.subr.bf16.mxu0 %v2340_v39 }
 0x250   :  { %2231 = vmatprep.mubr.bf16.mxu0 %v540_v38  ;;  %v2379_v38 = vld [vmem:[#allocation9 + $0x1a4] ss:$8 sps:$4 sm:$0xff]  }
 0x251   :  { %2232 = vmatmul.mubr.bf16.gmra.mrb[44].mxu0 %v541_v37 }
 0x252   :  { %862 = vmatpush1.bf16.msra.mxu0 %v2338_v40  ;;  %881 = vmatprep.mubr.bf16.mxu0 %v2655_v47 }
 0x253   :  { %863 = vmatprep.subr.bf16.mxu0 %v2346_v43 }
 0x256   :  { %864 = vmatpush1.bf16.msra.mxu0 %v2344_v34  ;;  %v2377_v34 = vld [vmem:[#allocation9 + $0x1a0] ss:$8 sps:$4 sm:$0xff]  }
 0x257   :  { %972 = vmatprep.subr.bf16.mxu0 %v2352_v46  ;;  %v2385_v46 = vld [vmem:[#allocation9 + $0x1b4] ss:$8 sps:$4 sm:$0xff]  }
 0x30c   :  { %v2221_v54 = vpop.f32.mrb[32].mxu0 }
 0x30d   :  { %v658_v55 = vadd.f32 %v2221_v54, %v2814_v53  ;;  %v649_v56 = vpop.f32.mrb[33].mxu0 }
 0x30e   :  { %v650_v57 = vadd.f32 %v2814_v53, %v649_v56  ;;  %v2222_v58 = vpop.f32.mrb[34].mxu0  ;;  %v2383_v56 = vld [vmem:[#allocation9 + $0x1b0] ss:$8 sps:$4 sm:$0xff]  }
 0x30f   :  { %v661_v59 = vadd.f32 %v2222_v58, %v2814_v53  ;;  %v652_v60 = vpop.f32.mrb[35].mxu0  ;;  %v714_v62 = vmax.f32 %v658_v55, 0.0 }
 0x310   :  { %v653_v61 = vadd.f32 %v2814_v53, %v652_v60  ;;  %v712_v0 = vmax.f32 %v650_v57, 0.0  ;;  %v2388_v57 = vld [vmem:[#allocation9 + $0x64] ss:$8 sps:$4 sm:$0xff]  }
 0x311   :  { %v715_v63 = vmax.f32 %v661_v59, 0.0 }
 0x312   :  { %v713_v1 = vmax.f32 %v653_v61, 0.0  ;;  %v2391_v61 = vld [vmem:[#allocation9 + $0x1c4] ss:$8 sps:$4 sm:$0xff]  }
 0x313   :  { %v729_v3 = vpack.c.bf16 %v715_v63, %v714_v62 }
 0x314   :  { %v2820_v5 = vpack.c.bf16 %v713_v1, %v712_v0  ;;  %v2225_v6 = vpop.f32.mrb[36].mxu0  ;;  %v2386_v1 = vld [vmem:[#allocation9 + $0x60] ss:$8 sps:$4 sm:$0xff]  }
 0x315   :  { %v674_v7 = vadd.f32 %v2225_v6, %v2814_v53  ;;  %v665_v8 = vpop.f32.mrb[37].mxu0  ;;  %882 = vmatmul.mubr.bf16.vlgmr.msra.gmra.mrb[48].mxu0 %v729_v3  ;;  %v2389_v3 = vld [vmem:[#allocation9 + $0x1c0] ss:$8 sps:$4 sm:$0xff]  }
 0x316   :  { %v666_v9 = vadd.f32 %v2814_v53, %v665_v8  ;;  %973 = vmatpush1.bf16.msra.mxu0 %v2350_v2  ;;  %v2226_v10 = vpop.f32.mrb[38].mxu0  ;;  %1004 = vmatprep.mubr.bf16.mxu0 %v2655_v47 }
 0x317   :  { %v677_v12 = vadd.f32 %v2226_v10, %v2814_v53  ;;  %v668_v13 = vpop.f32.mrb[39].mxu0  ;;  %974 = vmatprep.subr.bf16.mxu0 %v2358_v4  ;;  %v718_v16 = vmax.f32 %v674_v7, 0.0  ;;  %v2394_v4 = vld [vmem:[#allocation9 + $0x74] ss:$8 sps:$4 sm:$0xff]   ;;  %v2395_v10 = vld [vmem:[#allocation9 + $0x1d0] ss:$8 sps:$4 sm:$0xff]  }
 0x318   :  { %v669_v15 = vadd.f32 %v2814_v53, %v668_v13  ;;  %v716_v18 = vmax.f32 %v666_v9, 0.0  ;;  %v2397_v7 = vld [vmem:[#allocation9 + $0x1d4] ss:$8 sps:$4 sm:$0xff]   ;;  %v2392_v9 = vld [vmem:[#allocation9 + $0x70] ss:$8 sps:$4 sm:$0xff]  }
 0x319   :  { %v719_v17 = vmax.f32 %v677_v12, 0.0  ;;  %v2403_v12 = vld [vmem:[#allocation9 + $0x1f4] ss:$8 sps:$4 sm:$0xff]   ;;  %v2401_v13 = vld [vmem:[#allocation9 + $0x1f0] ss:$8 sps:$4 sm:$0xff]  }
 0x31a   :  { %v717_v19 = vmax.f32 %v669_v15, 0.0  ;;  %975 = vmatpush1.bf16.msra.mxu0 %v2356_v11  ;;  %v2398_v11 = vld [vmem:[#allocation9 + $0x1e0] ss:$8 sps:$4 sm:$0xff]  }
 0x31b   :  { %v2827_v21 = vpack.c.bf16 %v719_v17, %v718_v16  ;;  %976 = vmatprep.subr.bf16.mxu0 %v2364_v14  ;;  %v2406_v14 = vld [vmem:[#allocation9 + $0x204] ss:$8 sps:$4 sm:$0xff]   ;;  %v2404_v15 = vld [vmem:[#allocation9 + $0x200] ss:$8 sps:$4 sm:$0xff]   ;;  %v2409_v16 = vld [vmem:[#allocation9 + $0x214] ss:$8 sps:$4 sm:$0xff]  }
 0x31c   :  { %v730_v24 = vpack.c.bf16 %v717_v19, %v716_v18  ;;  %v2229_v27 = vpop.f32.mrb[40].mxu0  ;;  %v2407_v17 = vld [vmem:[#allocation9 + $0x210] ss:$8 sps:$4 sm:$0xff]   ;;  %v2412_v18 = vld [vmem:[#allocation9 + $0x224] ss:$8 sps:$4 sm:$0xff]  }
 0x31d   :  { %v690_v28 = vadd.f32 %v2229_v27, %v2814_v53  ;;  %v681_v25 = vpop.f32.mrb[41].mxu0  ;;  %v2410_v19 = vld [vmem:[#allocation9 + $0x220] ss:$8 sps:$4 sm:$0xff]  }
 0x31e   :  { %977 = vmatpush1.bf16.msra.mxu0 %v2362_v20  ;;  %1145 = vmatmul.mubr.bf16.vlgmr.msra.gmra.mrb[0].mxu1 %v730_v24  ;;  %v682_v30 = vadd.f32 %v2814_v53, %v681_v25  ;;  %v2230_v31 = vpop.f32.mrb[42].mxu0  ;;  %v2413_v20 = vld [vmem:[#allocation9 + $0x230] ss:$8 sps:$4 sm:$0xff]   ;;  %v2421_v24 = vld [vmem:[#allocation9 + $0x254] ss:$8 sps:$4 sm:$0xff]  }
 0x31f   :  { %1257 = vmatpush1.bf16.msra.mxu1 %v2365_v22  ;;  %978 = vmatprep.subr.bf16.mxu0 %v2370_v23  ;;  %v722_v35 = vmax.f32 %v690_v28, 0.0  ;;  %v693_v36 = vadd.f32 %v2230_v31, %v2814_v53  ;;  %v684_v37 = vpop.f32.mrb[43].mxu0  ;;  %v2418_v22 = vld [vmem:[#allocation9 + $0x244] ss:$8 sps:$4 sm:$0xff]   ;;  %v2416_v23 = vld [vmem:[#allocation9 + $0x240] ss:$8 sps:$4 sm:$0xff]  }
 0x320   :  { %1258 = vmatprep.subr.bf16.mxu1 %v2373_v26  ;;  %1288 = vmatprep.mubr.bf16.mxu1 %v2655_v47  ;;  %v720_v39 = vmax.f32 %v682_v30, 0.0  ;;  %v685_v40 = vadd.f32 %v2814_v53, %v684_v37  ;;  %v2424_v26 = vld [vmem:[#allocation9 + $0x264] ss:$8 sps:$4 sm:$0xff]   ;;  %v2422_v27 = vld [vmem:[#allocation9 + $0x260] ss:$8 sps:$4 sm:$0xff]  }
 0x321   :  { %v723_v41 = vmax.f32 %v693_v36, 0.0  ;;  %v2427_v28 = vld [vmem:[#allocation9 + $0x274] ss:$8 sps:$4 sm:$0xff]   ;;  %v2425_v25 = vld [vmem:[#allocation9 + $0x270] ss:$8 sps:$4 sm:$0xff]  }
 0x322   :  { %979 = vmatpush1.bf16.msra.mxu0 %v2368_v29  ;;  %v721_v43 = vmax.f32 %v685_v40, 0.0  ;;  %v2430_v29 = vld [vmem:[#allocation9 + $0x284] ss:$8 sps:$4 sm:$0xff]   ;;  %v2428_v30 = vld [vmem:[#allocation9 + $0x280] ss:$8 sps:$4 sm:$0xff]  }
 0x323   :  { %1259 = vmatpush1.bf16.msra.mxu1 %v2371_v32  ;;  %980 = vmatprep.subr.bf16.mxu0 %v2376_v33  ;;  %v2834_v45 = vpack.c.bf16 %v723_v41, %v722_v35  ;;  %v2433_v31 = vld [vmem:[#allocation9 + $0x294] ss:$8 sps:$4 sm:$0xff]   ;;  %v2431_v32 = vld [vmem:[#allocation9 + $0x290] ss:$8 sps:$4 sm:$0xff]   ;;  %v2436_v33 = vld [vmem:[#allocation9 + $0x2a4] ss:$8 sps:$4 sm:$0xff]  }
 0x324   :  { %1260 = vmatprep.subr.bf16.mxu1 %v2379_v38  ;;  %v2836_v48 = vpack.c.bf16 %v721_v43, %v720_v39  ;;  %v2233_v49 = vpop.f32.mrb[44].mxu0  ;;  %v2434_v35 = vld [vmem:[#allocation9 + $0x2a0] ss:$8 sps:$4 sm:$0xff]   ;;  %v2439_v36 = vld [vmem:[#allocation9 + $0x2b4] ss:$8 sps:$4 sm:$0xff]  }
 0x325   :  { %v706_v50 = vadd.f32 %v2233_v49, %v2814_v53  ;;  %v697_v51 = vpop.f32.mrb[45].mxu0  ;;  %v2437_v37 = vld [vmem:[#allocation9 + $0x2b0] ss:$8 sps:$4 sm:$0xff]   ;;  %v2442_v38 = vld [vmem:[#allocation9 + $0x2c4] ss:$8 sps:$4 sm:$0xff]  }
 0x326   :  { %981 = vmatpush1.bf16.msra.mxu0 %v2374_v42  ;;  %v698_v54 = vadd.f32 %v2814_v53, %v697_v51  ;;  %v2234_v55 = vpop.f32.mrb[46].mxu0  ;;  %v2440_v39 = vld [vmem:[#allocation9 + $0x2c0] ss:$8 sps:$4 sm:$0xff]   ;;  %v2445_v40 = vld [vmem:[#allocation9 + $0x2d4] ss:$8 sps:$4 sm:$0xff]  }
 0x327   :  { %1261 = vmatpush1.bf16.msra.mxu1 %v2377_v34  ;;  %982 = vmatprep.subr.bf16.mxu0 %v2382_v44  ;;  %v726_v58 = vmax.f32 %v706_v50, 0.0  ;;  %v709_v59 = vadd.f32 %v2234_v55, %v2814_v53  ;;  %v700_v60 = vpop.f32.mrb[47].mxu0  ;;  %v2443_v41 = vld [vmem:[#allocation9 + $0x2d0] ss:$8 sps:$4 sm:$0xff]   ;;  %v2448_v42 = vld [vmem:[#allocation9 + $0x2e4] ss:$8 sps:$4 sm:$0xff]  }
 0x328   :  { %1262 = vmatprep.subr.bf16.mxu1 %v2385_v46  ;;  %v724_v62 = vmax.f32 %v698_v54, 0.0  ;;  %v701_v63 = vadd.f32 %v2814_v53, %v700_v60  ;;  %v2400_v53 = vld [vmem:[#allocation9 + $0x1e4] ss:$8 sps:$4 sm:$0xff]   ;;  %v2446_v43 = vld [vmem:[#allocation9 + $0x2e0] ss:$8 sps:$4 sm:$0xff]  }
 0x329   :  { %v727_v0 = vmax.f32 %v709_v59, 0.0  ;;  %v2451_v34 = vld [vmem:[#allocation9 + $0x2f4] ss:$8 sps:$4 sm:$0xff]   ;;  %v2449_v44 = vld [vmem:[#allocation9 + $0x2f0] ss:$8 sps:$4 sm:$0xff]  }
 0x32a   :  { %983 = vmatpush1.bf16.msra.mxu0 %v2380_v52  ;;  %v725_v2 = vmax.f32 %v701_v63, 0.0  ;;  %v2454_v46 = vld [vmem:[#allocation9 + $0x304] ss:$8 sps:$4 sm:$0xff]   ;;  %v2457_v49 = vld [vmem:[#allocation9 + $0x314] ss:$8 sps:$4 sm:$0xff]  }
 0x32b   :  { %1263 = vmatpush1.bf16.msra.mxu1 %v2383_v56  ;;  %984 = vmatprep.subr.bf16.mxu0 %v2388_v57  ;;  %v2842_v6 = vpack.c.bf16 %v727_v0, %v726_v58  ;;  %v2455_v50 = vld [vmem:[#allocation9 + $0x310] ss:$8 sps:$4 sm:$0xff]   ;;  %v2460_v51 = vld [vmem:[#allocation9 + $0x324] ss:$8 sps:$4 sm:$0xff]   ;;  %v2458_v52 = vld [vmem:[#allocation9 + $0x320] ss:$8 sps:$4 sm:$0xff]  }
 0x32c   :  { %1264 = vmatprep.subr.bf16.mxu1 %v2391_v61  ;;  %v2844_v8 = vpack.c.bf16 %v725_v2, %v724_v62  ;;  %v2463_v54 = vld [vmem:[#allocation9 + $0x334] ss:$8 sps:$4 sm:$0xff]   ;;  %v2461_v55 = vld [vmem:[#allocation9 + $0x330] ss:$8 sps:$4 sm:$0xff]   ;;  %v2466_v56 = vld [vmem:[#allocation9 + $0x344] ss:$8 sps:$4 sm:$0xff]  }
 0x32d   :  { %v2464_v57 = vld [vmem:[#allocation9 + $0x340] ss:$8 sps:$4 sm:$0xff]   ;;  %v2469_v58 = vld [vmem:[#allocation9 + $0x354] ss:$8 sps:$4 sm:$0xff]   ;;  %v2472_v59 = vld [vmem:[#allocation9 + $0x364] ss:$8 sps:$4 sm:$0xff]  }
 0x32e   :  { %985 = vmatpush1.bf16.msra.mxu0 %v2386_v1  ;;  %v2470_v60 = vld [vmem:[#allocation9 + $0x360] ss:$8 sps:$4 sm:$0xff]   ;;  %v2475_v61 = vld [vmem:[#allocation9 + $0x374] ss:$8 sps:$4 sm:$0xff]   ;;  %v2473_v62 = vld [vmem:[#allocation9 + $0x370] ss:$8 sps:$4 sm:$0xff]  }
 0x32f   :  { %1265 = vmatpush1.bf16.msra.mxu1 %v2389_v3  ;;  %986 = vmatprep.subr.bf16.mxu0 %v2394_v4  ;;  %v2478_v63 = vld [vmem:[#allocation9 + $0x384] ss:$8 sps:$4 sm:$0xff]   ;;  %v2476_v0 = vld [vmem:[#allocation9 + $0x380] ss:$8 sps:$4 sm:$0xff]   ;;  %v2481_v1 = vld [vmem:[#allocation9 + $0x394] ss:$8 sps:$4 sm:$0xff]  }
 0x330   :  { %1266 = vmatprep.subr.bf16.mxu1 %v2397_v7  ;;  %v2479_v2 = vld [vmem:[#allocation9 + $0x390] ss:$8 sps:$4 sm:$0xff]   ;;  %v2484_v3 = vld [vmem:[#allocation9 + $0x3a4] ss:$8 sps:$4 sm:$0xff]   ;;  %v2482_v4 = vld [vmem:[#allocation9 + $0x3a0] ss:$8 sps:$4 sm:$0xff]  }
 0x331   :  { %v2487_v7 = vld [vmem:[#allocation9 + $0x3b4] ss:$8 sps:$4 sm:$0xff]  }
 0x332   :  { %987 = vmatpush1.bf16.msra.mxu0 %v2392_v9  ;;  %v2485_v9 = vld [vmem:[#allocation9 + $0x3b0] ss:$8 sps:$4 sm:$0xff]  }
 0x333   :  { %1267 = vmatpush1.bf16.msra.mxu1 %v2395_v10  ;;  %v2490_v10 = vld [vmem:[#allocation9 + $0x3c4] ss:$8 sps:$4 sm:$0xff]  }
 0x334   :  { %1268 = vmatprep.subr.bf16.mxu1 %v2400_v53  ;;  %v2488_v53 = vld [vmem:[#allocation9 + $0x3c0] ss:$8 sps:$4 sm:$0xff]  }
 0x335   :  { %1005 = vmatmul.mubr.bf16.vlgmr.msra.gmra.mrb[48].mxu0 %v2820_v5  ;;  %v2415_v5 = vld [vmem:[#allocation9 + $0x234] ss:$8 sps:$4 sm:$0xff]  }
 0x337   :  { %1269 = vmatpush1.bf16.msra.mxu1 %v2398_v11  ;;  %v2493_v11 = vld [vmem:[#allocation9 + $0x3d4] ss:$8 sps:$4 sm:$0xff]  }
 0x338   :  { %1270 = vmatprep.subr.bf16.mxu1 %v2403_v12  ;;  %v2496_v12 = vld [vmem:[#allocation9 + $0x3e4] ss:$8 sps:$4 sm:$0xff]  }
 0x33b   :  { %1271 = vmatpush1.bf16.msra.mxu1 %v2401_v13  ;;  %v2499_v13 = vld [vmem:[#allocation9 + $0x3f4] ss:$8 sps:$4 sm:$0xff]  }
 0x33c   :  { %1400 = vmatprep.subr.bf16.mxu1 %v2406_v14  ;;  %v2497_v14 = vld [vmem:[#allocation9 + $0x3f0] ss:$8 sps:$4 sm:$0xff]  }
 0x33e   :  { %1289 = vmatmul.mubr.bf16.vlgmr.msra.gmra.mrb[0].mxu1 %v2827_v21  ;;  %v2419_v21 = vld [vmem:[#allocation9 + $0x250] ss:$8 sps:$4 sm:$0xff]  }
 0x33f   :  { %1401 = vmatpush1.bf16.msra.mxu1 %v2404_v15  ;;  %1432 = vmatprep.mubr.bf16.mxu1 %v2655_v47 }
 0x340   :  { %1402 = vmatprep.subr.bf16.mxu1 %v2409_v16 }
 0x343   :  { %1403 = vmatpush1.bf16.msra.mxu1 %v2407_v17 }
 0x344   :  { %1404 = vmatprep.subr.bf16.mxu1 %v2412_v18 }
 0x347   :  { %1405 = vmatpush1.bf16.msra.mxu1 %v2410_v19  ;;  %v1881_v19 = vlaneseq }
 0x348   :  { %1406 = vmatprep.subr.bf16.mxu1 %v2415_v5 }
 0x349   :  { %v1882_v5 = vshrl.u32 %v1881_v19, 7 }
 0x34b   :  { %1407 = vmatpush1.bf16.msra.mxu1 %v2413_v20  ;;  %v1887_v20 = vsub.s32 1, %v1882_v5 }
 0x34c   :  { %1408 = vmatprep.subr.bf16.mxu1 %v2418_v22  ;;  %v1879_v22 = vld [vmem:[#allocation11] sm:$0x3] }
 0x34f   :  { %1409 = vmatpush1.bf16.msra.mxu1 %v2416_v23 }
 0x350   :  { %1410 = vmatprep.subr.bf16.mxu1 %v2421_v24  ;;  %v1888_v24 = vrot.slane %v1879_v22, %v1887_v20 }
 0x353   :  { %1411 = vmatpush1.bf16.msra.mxu1 %v2419_v21 }
 0x354   :  { %1412 = vmatprep.subr.bf16.mxu1 %v2424_v26 }
 0x357   :  { %1413 = vmatpush1.bf16.msra.mxu1 %v2422_v27 }
 0x358   :  { %1414 = vmatprep.subr.bf16.mxu1 %v2427_v28 }
 0x35b   :  { %1415 = vmatpush1.bf16.msra.mxu1 %v2425_v25 }
 0x35c   :  { %1544 = vmatprep.subr.bf16.mxu1 %v2430_v29 }
 0x35e   :  { %1433 = vmatmul.mubr.bf16.vlgmr.msra.gmra.mrb[0].mxu1 %v2836_v48  ;;  %v2452_v48 = vld [vmem:[#allocation9 + $0x300] ss:$8 sps:$4 sm:$0xff]  }
 0x35f   :  { %1545 = vmatpush1.bf16.msra.mxu1 %v2428_v30  ;;  %1576 = vmatprep.mubr.bf16.mxu1 %v2655_v47 }
 0x360   :  { %1546 = vmatprep.subr.bf16.mxu1 %v2433_v31 }
 0x363   :  { %1547 = vmatpush1.bf16.msra.mxu1 %v2431_v32 }
 0x364   :  { %1548 = vmatprep.subr.bf16.mxu1 %v2436_v33  ;;  %v1883_v33 = vsub.s32 0, %v1882_v5 }
 0x367   :  { %1549 = vmatpush1.bf16.msra.mxu1 %v2434_v35 }
 0x368   :  { %1550 = vmatprep.subr.bf16.mxu1 %v2439_v36 }
 0x36b   :  { %1551 = vmatpush1.bf16.msra.mxu1 %v2437_v37 }
 0x36c   :  { %1552 = vmatprep.subr.bf16.mxu1 %v2442_v38  ;;  %v1884_v38 = vrot.slane %v1879_v22, %v1883_v33 }
 0x36f   :  { %1553 = vmatpush1.bf16.msra.mxu1 %v2440_v39 }
 0x370   :  { %1554 = vmatprep.subr.bf16.mxu1 %v2445_v40  ;;  %v1896_v40 = vstv %s2875_s1 }
 0x373   :  { %1555 = vmatpush1.bf16.msra.mxu1 %v2443_v41 }
 0x374   :  { %1556 = vmatprep.subr.bf16.mxu1 %v2448_v42 }
 0x377   :  { %1557 = vmatpush1.bf16.msra.mxu1 %v2446_v43 }
 0x378   :  { %1558 = vmatprep.subr.bf16.mxu1 %v2451_v34 }
 0x37b   :  { %1559 = vmatpush1.bf16.msra.mxu1 %v2449_v44 }
 0x37c   :  { %1688 = vmatprep.subr.bf16.mxu1 %v2454_v46 }
 0x37e   :  { %1577 = vmatmul.mubr.bf16.vlgmr.msra.gmra.mrb[0].mxu1 %v2834_v45  ;;  %v2467_v45 = vld [vmem:[#allocation9 + $0x350] ss:$8 sps:$4 sm:$0xff]  }
 0x37f   :  { %1689 = vmatpush1.bf16.msra.mxu1 %v2452_v48  ;;  %1720 = vmatprep.mubr.bf16.mxu1 %v2655_v47 }
 0x380   :  { %1690 = vmatprep.subr.bf16.mxu1 %v2457_v49 }
 0x383   :  { %1691 = vmatpush1.bf16.msra.mxu1 %v2455_v50 }
 0x384   :  { %1692 = vmatprep.subr.bf16.mxu1 %v2460_v51 }
 0x387   :  { %1693 = vmatpush1.bf16.msra.mxu1 %v2458_v52 }
 0x388   :  { %1694 = vmatprep.subr.bf16.mxu1 %v2463_v54 }
 0x38b   :  { %1695 = vmatpush1.bf16.msra.mxu1 %v2461_v55 }
 0x38c   :  { %1696 = vmatprep.subr.bf16.mxu1 %v2466_v56 }
 0x38f   :  { %1697 = vmatpush1.bf16.msra.mxu1 %v2464_v57 }
 0x390   :  { %1698 = vmatprep.subr.bf16.mxu1 %v2469_v58 }
 0x393   :  { %1699 = vmatpush1.bf16.msra.mxu1 %v2467_v45 }
 0x394   :  { %1700 = vmatprep.subr.bf16.mxu1 %v2472_v59 }
 0x397   :  { %1701 = vmatpush1.bf16.msra.mxu1 %v2470_v60 }
 0x398   :  { %1702 = vmatprep.subr.bf16.mxu1 %v2475_v61 }
 0x39b   :  { %1703 = vmatpush1.bf16.msra.mxu1 %v2473_v62 }
 0x39c   :  { %1832 = vmatprep.subr.bf16.mxu1 %v2478_v63 }
 0x39e   :  { %1721 = vmatmul.mubr.bf16.vlgmr.msra.gmra.mrb[0].mxu1 %v2844_v8  ;;  %v2491_v8 = vld [vmem:[#allocation9 + $0x3d0] ss:$8 sps:$4 sm:$0xff]  }
 0x39f   :  { %1833 = vmatpush1.bf16.msra.mxu1 %v2476_v0  ;;  %1864 = vmatprep.mubr.bf16.mxu1 %v2655_v47  ;;  %v2494_v47 = vld [vmem:[#allocation9 + $0x3e0] ss:$8 sps:$4 sm:$0xff]  }
 0x3a0   :  { %1834 = vmatprep.subr.bf16.mxu1 %v2481_v1 }
 0x3a3   :  { %1835 = vmatpush1.bf16.msra.mxu1 %v2479_v2 }
 0x3a4   :  { %1836 = vmatprep.subr.bf16.mxu1 %v2484_v3 }
 0x3a7   :  { %1837 = vmatpush1.bf16.msra.mxu1 %v2482_v4 }
 0x3a8   :  { %1838 = vmatprep.subr.bf16.mxu1 %v2487_v7 }
 0x3ab   :  { %1839 = vmatpush1.bf16.msra.mxu1 %v2485_v9 }
 0x3ac   :  { %1840 = vmatprep.subr.bf16.mxu1 %v2490_v10 }
 0x3af   :  { %1841 = vmatpush1.bf16.msra.mxu1 %v2488_v53 }
 0x3b0   :  { %1842 = vmatprep.subr.bf16.mxu1 %v2493_v11 }
 0x3b3   :  { %1843 = vmatpush1.bf16.msra.mxu1 %v2491_v8 }
 0x3b4   :  { %1844 = vmatprep.subr.bf16.mxu1 %v2496_v12 }
 0x3b7   :  { %1845 = vmatpush1.bf16.msra.mxu1 %v2494_v47 }
 0x3b8   :  { %1846 = vmatprep.subr.bf16.mxu1 %v2499_v13 }
 0x3bb   :  { %1847 = vmatpush1.bf16.msra.mxu1 %v2497_v14 }
 0x3be   :  { %1865 = vmatmul.mubr.bf16.vlgmr.msra.gmra.mrb[0].mxu1 %v2842_v6 }
 0x408   :  { %v1006_v15 = vpop.f32.mrb[48].mxu0 }
 0x409   :  { %v1008_v16 = vpop.f32.mrb[49].mxu0 }
 0x40a   :  { %v1010_v17 = vpop.f32.mrb[50].mxu0 }
 0x40b   :  { %v1012_v18 = vpop.f32.mrb[51].mxu0 }
 0x491   :  { %v1866_v23 = vpop.f32.mrb[0].mxu1 }
 0x492   :  { %v2235_v21 = vadd.f32 %v1866_v23, %v1006_v15  ;;  %v1868_v26 = vpop.f32.mrb[1].mxu1 }
 0x493   :  { %v2236_v27 = vadd.f32 %v1868_v26, %v1008_v16  ;;  %v1870_v28 = vpop.f32.mrb[2].mxu1 }
 0x494   :  { %v2237_v25 = vadd.f32 %v1870_v28, %v1010_v17  ;;  %v1872_v29 = vpop.f32.mrb[3].mxu1  ;;  %v1891_v39 = vadd.f32 %v2235_v21, %v1884_v38 }
 0x495   :  { %v1892_v30 = vadd.f32 %v2236_v27, %v1888_v24  ;;  %v2238_v31 = vadd.f32 %v1872_v29, %v1012_v18 }
 0x496   :  { %v1893_v41 = vadd.f32 %v2237_v25, %v1884_v38  ;;  %v1897_v42 = vmul.f32 %v1896_v40, %v1891_v39 }
 0x497   :  { %v1899_v32 = vmul.f32 0.5, %v1892_v30  ;;  %v1894_v6 = vadd.f32 %v2238_v31, %v1888_v24 }
 0x498   :  { %v1898_v34 = vmul.f32 %v1896_v40, %v1893_v41 }
 0x499   :  { %v1901_v35 = vmul.f32 1.442695, %v1899_v32  ;;  %v1900_v36 = vmul.f32 0.5, %v1894_v6 }
 0x49b   :  { %2500 = vpow2.f32 %v1901_v35  ;;  %v1903_v37 = vmul.f32 1.442695, %v1900_v36 }
 0x49d   :  { %2502 = vpow2.f32 %v1903_v37 }
 0x4a5   :  { %v2501_v43 = vpop.eup %2500 }
 0x4a6   :  { %v1905_v44 = vadd.f32 %v2501_v43, %v1897_v42 }
 0x4a7   :  { %v2503_v46 = vpop.eup %2502 }
 0x4a8   :  { %v1906_v48 = vadd.f32 %v2503_v46, %v1898_v34  ;;  %1907 = vst [vmem:[#allocation12] sm:$0xff] %v1905_v44 }
 0x4aa   :  { %1908 = vst [vmem:[#allocation12 + $0x8] sm:$0xff] %v1906_v48 }
 0x4ab   :  { %2625 = shalt.err (!%p2622_p2)
}
 0x4ac   :  { %s2626_s19 = scalar_lea.hbm %s2880_s6, 256 }
 0x4ad   :  { %p2627_p3 = scmp.ne.s32.totalorder %s2880_s6, %s2626_s19  ;;  %p2630_p4 = scmp.lt.u32.totalorder %s2626_s19, %s2880_s6 }
 0x4af   :  { %p2632_p5 = pnand %p2630_p4, %p2627_p3 }
 0x4b1   :  { %2635 = shalt.err (!%p2632_p5)
}
 0x4b2   :  { %1920 = dma.vmem_to_hbm [thread:$0]  %s1915_s16, 256, %s2880_s6, [#allocation5], %s2648_s2, %s2648_s2, %s2649_s21  }
 0x4b3   :  { %2642 = dma.done.wait [#allocation5], 256  }
 0x4b4   :  { %2643 = vsyncadd [#allocation5], 4294967040 }
 0x4b5   :  { %1924 = vsyncpa [#allocation4], 1 }
 0x4b6   :  { %1925 = vsyncpa [#allocation7], 1 }
 0x4b7   :  { %1926 = vsyncpa [#allocation10], 1 }
 0x4b8   :  { %1927 = vsyncpa [#allocation5], 1 }

</bundles_post_ra>
